<compile_context>
chip_gen: v7x
topology: tpu7x:2x2x1
jax: 0.10.0
libtpu: 0.0.40
codegen_flags: <defaults>
</compile_context>

<pallas_src>
import functools

import jax
import jax.numpy as jnp
from jax.experimental import pallas as pl
from jax.experimental.pallas import tpu as pltpu

LANE = 128
SUBLANE = 8
DEFAULT_MAX_TM = 1024   # per-step row tile cap (working set is KiBs at these widths)


def _round_up(x, m):
    return ((x + m - 1) // m) * m


def _choose_row_tile(n, max_tm=DEFAULT_MAX_TM):
    """Row tile selection.

    - n <= max_tm: one grid step (grid steps are a serial loop on single-TC
      v5e/v6e; per-call fixed cost dominates at small n).
    - n  > max_tm: an EVEN number of steps so v7x's 2 TensorCores get balanced
      work on the 'parallel' axis (harmless on single-TC chips).
    Tile is always a multiple of 8 sublanes.
    """
    if n <= max_tm:
        return _round_up(n, SUBLANE)
    steps = _round_up(pl.cdiv(n, max_tm), 2)
    return _round_up(pl.cdiv(n, steps), SUBLANE)


# ----------------------------------------------------------------------------
# Fused MLP kernel: the entire Linear -> LayerNorm -> ReLU stack in one body.
# ----------------------------------------------------------------------------
def _edge_mlp_kernel(x_ref, w_ref, bgb_ref, o_ref, *, layer_dims,
                     use_layer_norm, eps):
    # NOTE: ragged-tail rows (block padding beyond the real row count) flow
    # through the body; eps keeps rsqrt finite and all math is strictly
    # row-wise, so junk rows never contaminate real rows and are masked on the
    # boundary store.
    x = x_ref[...]                     # (TM, d_in0) f32
    w_all = w_ref[...]                 # (L, d_in_max, d_out_max) — one small load
    bgb_all = bgb_ref[...]             # (3L, d_out_max)

    for layer, (din, dout) in enumerate(layer_dims):
        w = w_all[layer, :din, :dout]                          # static slices only
        b = bgb_all[3 * layer + 0: 3 * layer + 1, :dout]       # (1, dout)
        g = bgb_all[3 * layer + 1: 3 * layer + 2, :dout]
        be = bgb_all[3 * layer + 2: 3 * layer + 3, :dout]

        # MXU matmul, f32 accumulation. Intermediates stay in VMEM / vregs.
        y = jnp.dot(x, w, preferred_element_type=jnp.float32) + b   # (TM, dout)

        if use_layer_norm:
            # Exact (unpadded) LayerNorm over the real feature width.
            mean = jnp.mean(y, axis=-1, keepdims=True)
            centered = y - mean
            var = jnp.mean(centered * centered, axis=-1, keepdims=True)
            y = centered * jax.lax.rsqrt(var + eps)
            y = y * g + be

        x = jnp.maximum(y, 0.0)        # ReLU
        # (Dropout is identity: eval mode / use_dropout=False.)

    o_ref[...] = x.astype(o_ref.dtype)  # unpadded (TM, d_out) store


def edge_mlp_forward(x, w_stack, bgb_stack, layer_dims, *, use_layer_norm=True,
                     eps=1e-5, max_tm=DEFAULT_MAX_TM):
    """Fused edge-MLP stack: one pallas_call for the whole MLP.

    x: (N, D_in) float32.
    w_stack:   (L, d_in_max, d_out_max) zero-padded stacked weights.
    bgb_stack: (3*L, d_out_max) stacked [bias; gamma; beta] per layer.
    layer_dims: static tuple of (d_in, d_out) per layer.
    """
    n, d_in = x.shape
    assert layer_dims[0][0] == d_in, "input_dim mismatch with first layer"
    d_out = layer_dims[-1][1]
    num_layers, d_in_max, d_out_max = w_stack.shape

    tm = _choose_row_tile(n, max_tm)
    grid = (pl.cdiv(n, tm),)           # ragged tail handled by Pallas boundary masking

    kernel = functools.partial(
        _edge_mlp_kernel,
        layer_dims=layer_dims,
        use_layer_norm=use_layer_norm,
        eps=eps,
    )

    return pl.pallas_call(
        kernel,
        out_shape=jax.ShapeDtypeStruct((n, d_out), jnp.float32),
        grid_spec=pltpu.PrefetchScalarGridSpec(
            num_scalar_prefetch=0,
            grid=grid,
            in_specs=[
                # activations: tiled over rows
                pl.BlockSpec((tm, d_in), lambda i: (i, 0)),
                # all weights, one ref, constant across the grid
                pl.BlockSpec((num_layers, d_in_max, d_out_max),
                             lambda i: (0, 0, 0)),
                # all bias/gamma/beta rows, one ref, constant across the grid
                pl.BlockSpec((3 * num_layers, d_out_max), lambda i: (0, 0)),
            ],
            # Last dim d_out (=32) < 128 is legal because it equals the full
            # array dim — unpadded writeback, no wrapper-side slice needed.
            out_specs=pl.BlockSpec((tm, d_out), lambda i: (i, 0)),
        ),
        compiler_params=pltpu.CompilerParams(
            dimension_semantics=("parallel",)),
    )(x, w_stack, bgb_stack)


# ----------------------------------------------------------------------------
# Parameter init (PyTorch-style uniform fan-in for Linear, ones/zeros for LN)
# and one-time packing into the consolidated kernel layout.
# ----------------------------------------------------------------------------
def init_mlp_params(key, input_dim, hidden_dims):
    params = []
    in_dim = input_dim
    for h_dim in hidden_dims:
        key, kw, kb = jax.random.split(key, 3)
        bound = 1.0 / jnp.sqrt(in_dim)
        w = jax.random.uniform(kw, (in_dim, h_dim), jnp.float32, -bound, bound)
        b = jax.random.uniform(kb, (h_dim,), jnp.float32, -bound, bound)
        gamma = jnp.ones((h_dim,), jnp.float32)
        beta = jnp.zeros((h_dim,), jnp.float32)
        params.append((w, b, gamma, beta))
        in_dim = h_dim
    return params


def pack_mlp_params(params):
    """Stack per-layer params into two arrays (zero padding is sliced away
    statically inside the kernel, so it never affects the math)."""
    layer_dims = tuple((w.shape[0], w.shape[1]) for (w, _, _, _) in params)
    d_in_max = max(d for d, _ in layer_dims)
    d_out_max = max(d for _, d in layer_dims)

    w_stack = jnp.stack([
        jnp.pad(w, ((0, d_in_max - w.shape[0]), (0, d_out_max - w.shape[1])))
        for (w, _, _, _) in params
    ])                                                    # (L, d_in_max, d_out_max)

    bgb_rows = []
    for (_, b, g, be) in params:
        pad = d_out_max - b.shape[0]
        bgb_rows += [jnp.pad(b, (0, pad)), jnp.pad(g, (0, pad)),
                     jnp.pad(be, (0, pad))]
    bgb_stack = jnp.stack(bgb_rows)                        # (3L, d_out_max)

    return w_stack, bgb_stack, layer_dims


# ----------------------------------------------------------------------------
# Ultra.forward
# ----------------------------------------------------------------------------
@functools.partial(jax.jit, static_argnames=("layer_dims",))
def ultra_forward(conv_edge_projection, target_edge_projections,
                  w_stack, bgb_stack, *, layer_dims):
    # Logged statistics (torch .mean()/.std()/.var() — std/var unbiased).
    conv_proj_mean = jnp.mean(conv_edge_projection)
    conv_proj_std = jnp.std(conv_edge_projection, ddof=1)
    conv_proj_var = jnp.var(conv_edge_projection, ddof=1)

    # ONE fused kernel launch for BOTH edge sets: concat rows, split after.
    n_conv = conv_edge_projection.shape[0]
    x_all = jnp.concatenate([conv_edge_projection, target_edge_projections], axis=0)
    emb_all = edge_mlp_forward(x_all, w_stack, bgb_stack, layer_dims)
    conv_edge_embedding = emb_all[:n_conv]
    target_edge_embedding = emb_all[n_conv:]

    conv_emb_mean = jnp.mean(conv_edge_embedding)
    conv_emb_std = jnp.std(conv_edge_embedding, ddof=1)
    conv_emb_var = jnp.var(conv_edge_embedding, ddof=1)

    # TODO(synk): score = self.simple_model(data, batch, conv_edge_embedding,
    #             target_edge_embedding) — simple_model class comes from the config
    #             and is not defined in the provided source; returning embeddings.
    return {
        "conv_edge_projection_stats": (conv_proj_mean, conv_proj_std, conv_proj_var),
        "conv_edge_embedding": conv_edge_embedding,
        "conv_edge_embedding_stats": (conv_emb_mean, conv_emb_std, conv_emb_var),
        "target_edge_embedding": target_edge_embedding,
    }


if __name__ == "__main__":
    key = jax.random.PRNGKey(0)
    k_conv, k_tgt, k_params = jax.random.split(key, 3)

    # Small synthetic shapes: edge projections are [num_edges, input_dim].
    input_dim = 16
    edge_emb_dim = 32                 # hidden_dims[0] == edge embedding dim
    hidden_dims = [edge_emb_dim, edge_emb_dim]
    num_conv_edges = 200              # deliberately not a power of two
    num_target_edges = 96

    conv_edge_projection = jax.random.normal(
        k_conv, (num_conv_edges, input_dim), jnp.float32)
    target_edge_projections = jax.random.normal(
        k_tgt, (num_target_edges, input_dim), jnp.float32)

    edge_mlp_params = init_mlp_params(k_params, input_dim, hidden_dims)
    w_stack, bgb_stack, layer_dims = pack_mlp_params(edge_mlp_params)

    out = ultra_forward(conv_edge_projection, target_edge_projections,
                        w_stack, bgb_stack, layer_dims=layer_dims)
    jax.block_until_ready(out)

    # Sanity checks against a pure-JAX reference of the MLP stack.
    def ref_mlp(x, params, eps=1e-5):
        for (w, b, g, be) in params:
            y = x @ w + b
            m = y.mean(axis=-1, keepdims=True)
            v = ((y - m) ** 2).mean(axis=-1, keepdims=True)
            y = (y - m) / jnp.sqrt(v + eps) * g + be
            x = jnp.maximum(y, 0.0)
        return x

    ref_conv = ref_mlp(conv_edge_projection, edge_mlp_params)
    ref_tgt = ref_mlp(target_edge_projections, edge_mlp_params)

    assert out["conv_edge_embedding"].shape == (num_conv_edges, edge_emb_dim)
    assert out["target_edge_embedding"].shape == (num_target_edges, edge_emb_dim)
    assert jnp.allclose(out["conv_edge_embedding"], ref_conv, atol=1e-4, rtol=1e-4)
    assert jnp.allclose(out["target_edge_embedding"], ref_tgt, atol=1e-4, rtol=1e-4)
    assert jnp.allclose(out["conv_edge_embedding_stats"][0], ref_conv.mean(),
                        atol=1e-5, rtol=1e-5)
    assert jnp.allclose(out["conv_edge_embedding_stats"][2],
                        jnp.var(ref_conv, ddof=1), atol=1e-5, rtol=1e-5)

    print("KERNEL_OK")
</pallas_src>

<mosaic_0001>
module attributes {stable_mosaic.version = 11 : i64} {
  func.func @_edge_mlp_kernel(%arg0: i32, %arg1: memref<296x16xf32, #tpu.memory_space<vmem>>, %arg2: memref<2x32x32xf32, #tpu.memory_space<vmem>>, %arg3: memref<6x32xf32, #tpu.memory_space<vmem>>, %arg4: memref<296x32xf32, #tpu.memory_space<vmem>>) attributes {dimension_semantics = [#tpu.dimension_semantics<parallel>], iteration_bounds = array<i64: 1>, scalar_prefetch = 0 : i64, scratch_operands = 0 : i64, tpu.core_type = #tpu.core_type<tc>, window_params = [{transform_indices = @transform_0, window_bounds = array<i64: 296, 16>}, {pipeline_mode = #tpu.pipeline_mode<synchronous>, transform_indices = @transform_1, window_bounds = array<i64: 2, 32, 32>}, {pipeline_mode = #tpu.pipeline_mode<synchronous>, transform_indices = @transform_2, window_bounds = array<i64: 6, 32>}, {transform_indices = @transform_3, window_bounds = array<i64: 296, 32>}]} {
    %c0 = arith.constant 0 : index
    %c0_0 = arith.constant 0 : index
    %0 = vector.load %arg1[%c0, %c0_0] : memref<296x16xf32, #tpu.memory_space<vmem>>, vector<296x16xf32>
    %c0_1 = arith.constant 0 : index
    %c0_2 = arith.constant 0 : index
    %c0_3 = arith.constant 0 : index
    %1 = vector.load %arg2[%c0_1, %c0_2, %c0_3] : memref<2x32x32xf32, #tpu.memory_space<vmem>>, vector<2x32x32xf32>
    %c0_4 = arith.constant 0 : index
    %c0_5 = arith.constant 0 : index
    %2 = vector.load %arg3[%c0_4, %c0_5] : memref<6x32xf32, #tpu.memory_space<vmem>>, vector<6x32xf32>
    %3 = vector.extract_strided_slice %1 {offsets = [0, 0, 0], sizes = [1, 16, 32], strides = [1, 1, 1]} : vector<2x32x32xf32> to vector<1x16x32xf32>
    %4 = vector.shape_cast %3 : vector<1x16x32xf32> to vector<16x32xf32>
    %5 = vector.extract_strided_slice %2 {offsets = [0, 0], sizes = [1, 32], strides = [1, 1]} : vector<6x32xf32> to vector<1x32xf32>
    %6 = vector.extract_strided_slice %2 {offsets = [1, 0], sizes = [1, 32], strides = [1, 1]} : vector<6x32xf32> to vector<1x32xf32>
    %7 = vector.extract_strided_slice %2 {offsets = [2, 0], sizes = [1, 32], strides = [1, 1]} : vector<6x32xf32> to vector<1x32xf32>
    %cst = arith.constant dense<0.000000e+00> : vector<296x32xf32>
    %8 = tpu.matmul %0, %4, %cst {dimension_numbers = #tpu.dot_dimension_numbers<[1], [0], [0], [1], [0, 0, 1, 1], [], []>} : vector<296x16xf32>, vector<16x32xf32>, vector<296x32xf32> -> vector<296x32xf32>
    %9 = vector.broadcast %5 : vector<1x32xf32> to vector<296x32xf32>
    %10 = arith.addf %8, %9 : vector<296x32xf32>
    %cst_6 = arith.constant dense<0.000000e+00> : vector<296xf32>
    %11 = vector.multi_reduction <add>, %10, %cst_6 [1] : vector<296x32xf32> to vector<296xf32>
    %12 = vector.shape_cast %11 : vector<296xf32> to vector<296x1xf32>
    %cst_7 = arith.constant 3.200000e+01 : f32
    %13 = vector.broadcast %cst_7 : f32 to vector<296x1xf32>
    %14 = arith.divf %12, %13 : vector<296x1xf32>
    %15 = vector.broadcast %14 : vector<296x1xf32> to vector<296x32xf32>
    %16 = arith.subf %10, %15 : vector<296x32xf32>
    %17 = arith.mulf %16, %16 : vector<296x32xf32>
    %cst_8 = arith.constant dense<0.000000e+00> : vector<296xf32>
    %18 = vector.multi_reduction <add>, %17, %cst_8 [1] : vector<296x32xf32> to vector<296xf32>
    %19 = vector.shape_cast %18 : vector<296xf32> to vector<296x1xf32>
    %cst_9 = arith.constant 3.200000e+01 : f32
    %20 = vector.broadcast %cst_9 : f32 to vector<296x1xf32>
    %21 = arith.divf %19, %20 : vector<296x1xf32>
    %cst_10 = arith.constant 9.99999974E-6 : f32
    %22 = vector.broadcast %cst_10 : f32 to vector<296x1xf32>
    %23 = arith.addf %21, %22 : vector<296x1xf32>
    %24 = math.rsqrt %23 : vector<296x1xf32>
    %25 = vector.broadcast %24 : vector<296x1xf32> to vector<296x32xf32>
    %26 = arith.mulf %16, %25 : vector<296x32xf32>
    %27 = vector.broadcast %6 : vector<1x32xf32> to vector<296x32xf32>
    %28 = arith.mulf %26, %27 : vector<296x32xf32>
    %29 = vector.broadcast %7 : vector<1x32xf32> to vector<296x32xf32>
    %30 = arith.addf %28, %29 : vector<296x32xf32>
    %cst_11 = arith.constant 0.000000e+00 : f32
    %31 = vector.broadcast %cst_11 : f32 to vector<296x32xf32>
    %32 = arith.maximumf %30, %31 : vector<296x32xf32>
    %33 = vector.extract_strided_slice %1 {offsets = [1, 0, 0], sizes = [1, 32, 32], strides = [1, 1, 1]} : vector<2x32x32xf32> to vector<1x32x32xf32>
    %34 = vector.shape_cast %33 : vector<1x32x32xf32> to vector<32x32xf32>
    %35 = vector.extract_strided_slice %2 {offsets = [3, 0], sizes = [1, 32], strides = [1, 1]} : vector<6x32xf32> to vector<1x32xf32>
    %36 = vector.extract_strided_slice %2 {offsets = [4, 0], sizes = [1, 32], strides = [1, 1]} : vector<6x32xf32> to vector<1x32xf32>
    %37 = vector.extract_strided_slice %2 {offsets = [5, 0], sizes = [1, 32], strides = [1, 1]} : vector<6x32xf32> to vector<1x32xf32>
    %cst_12 = arith.constant dense<0.000000e+00> : vector<296x32xf32>
    %38 = tpu.matmul %32, %34, %cst_12 {dimension_numbers = #tpu.dot_dimension_numbers<[1], [0], [0], [1], [0, 0, 1, 1], [], []>} : vector<296x32xf32>, vector<32x32xf32>, vector<296x32xf32> -> vector<296x32xf32>
    %39 = vector.broadcast %35 : vector<1x32xf32> to vector<296x32xf32>
    %40 = arith.addf %38, %39 : vector<296x32xf32>
    %cst_13 = arith.constant dense<0.000000e+00> : vector<296xf32>
    %41 = vector.multi_reduction <add>, %40, %cst_13 [1] : vector<296x32xf32> to vector<296xf32>
    %42 = vector.shape_cast %41 : vector<296xf32> to vector<296x1xf32>
    %cst_14 = arith.constant 3.200000e+01 : f32
    %43 = vector.broadcast %cst_14 : f32 to vector<296x1xf32>
    %44 = arith.divf %42, %43 : vector<296x1xf32>
    %45 = vector.broadcast %44 : vector<296x1xf32> to vector<296x32xf32>
    %46 = arith.subf %40, %45 : vector<296x32xf32>
    %47 = arith.mulf %46, %46 : vector<296x32xf32>
    %cst_15 = arith.constant dense<0.000000e+00> : vector<296xf32>
    %48 = vector.multi_reduction <add>, %47, %cst_15 [1] : vector<296x32xf32> to vector<296xf32>
    %49 = vector.shape_cast %48 : vector<296xf32> to vector<296x1xf32>
    %cst_16 = arith.constant 3.200000e+01 : f32
    %50 = vector.broadcast %cst_16 : f32 to vector<296x1xf32>
    %51 = arith.divf %49, %50 : vector<296x1xf32>
    %cst_17 = arith.constant 9.99999974E-6 : f32
    %52 = vector.broadcast %cst_17 : f32 to vector<296x1xf32>
    %53 = arith.addf %51, %52 : vector<296x1xf32>
    %54 = math.rsqrt %53 : vector<296x1xf32>
    %55 = vector.broadcast %54 : vector<296x1xf32> to vector<296x32xf32>
    %56 = arith.mulf %46, %55 : vector<296x32xf32>
    %57 = vector.broadcast %36 : vector<1x32xf32> to vector<296x32xf32>
    %58 = arith.mulf %56, %57 : vector<296x32xf32>
    %59 = vector.broadcast %37 : vector<1x32xf32> to vector<296x32xf32>
    %60 = arith.addf %58, %59 : vector<296x32xf32>
    %cst_18 = arith.constant 0.000000e+00 : f32
    %61 = vector.broadcast %cst_18 : f32 to vector<296x32xf32>
    %62 = arith.maximumf %60, %61 : vector<296x32xf32>
    %c0_19 = arith.constant 0 : index
    %c0_20 = arith.constant 0 : index
    %63 = vector.load %arg4[%c0_19, %c0_20] : memref<296x32xf32, #tpu.memory_space<vmem>>, vector<296x32xf32>
    tpu.vector_store %arg4[%c0_19, %c0_20], %62 {strides = array<i32>} : memref<296x32xf32, #tpu.memory_space<vmem>>, vector<296x32xf32>,
    return
  }
  func.func @transform_0(%arg0: i32) -> (i32, i32) {
    %c0_i32 = arith.constant 0 : i32
    %c0_i32_0 = arith.constant 0 : i32
    return %arg0, %c0_i32 : i32, i32
  }
  func.func @transform_1(%arg0: i32) -> (i32, i32, i32) {
    %c0_i32 = arith.constant 0 : i32
    %c0_i32_0 = arith.constant 0 : i32
    %c0_i32_1 = arith.constant 0 : i32
    %c0_i32_2 = arith.constant 0 : i32
    return %c0_i32, %c0_i32_0, %c0_i32_1 : i32, i32, i32
  }
  func.func @transform_2(%arg0: i32) -> (i32, i32) {
    %c0_i32 = arith.constant 0 : i32
    %c0_i32_0 = arith.constant 0 : i32
    %c0_i32_1 = arith.constant 0 : i32
    return %c0_i32, %c0_i32_0 : i32, i32
  }
  func.func @transform_3(%arg0: i32) -> (i32, i32) {
    %c0_i32 = arith.constant 0 : i32
    %c0_i32_0 = arith.constant 0 : i32
    return %arg0, %c0_i32 : i32, i32
  }
}

</mosaic_0001>

<bundles_post_ra>
// kernel: ultra_forward.1
= control target key start
LH: loop header
LB: loop body
LE: loop exit
PB: predicated region body
PF: predicated region fallthrough
CT: control target
= control target key end

     0   :  { %v2581_v0 = vmov 0.0|0.0   ;;  %vm2582_vm0 = vmmov 0   ;;  %v2583_v3 = vmov 0.0   ;;  %vm62_vm1 = vcmask 130048   ;;  %s4178_s1 = inlined_call_operand.vmem [shape: f32[2,32,32], index: 1, kind: input, shape index: {}]   ;;  %s4179_s0 = inlined_call_operand.vmem [shape: f32[296,16], index: 0, kind: input, shape index: {}]   ;;  %s4180_s2 = inlined_call_operand.vmem [shape: f32[6,32], index: 2, kind: input, shape index: {}]   ;;  %s4181_s3 = inlined_call_operand.vmem [shape: f32[296,32], index: 3, kind: output, shape index: {}]  }
   0x1   :  { %2420 = vmatprep.subr.bf16.mxu0 %v2581_v0  ;;  %v51_v1 = vld [vmem:[%s4178_s1] sm:$0xff]  ;;  %v52_v2 = vld [vmem:[%s4178_s1 + $0x8] sm:$0xff]  ;;  %2190 = vmatprep.mubr.msk.f32.mxu0 %vm2582_vm0, %v2583_v3  ;;  %v16_v7 = vld [vmem:[%s4179_s0 + $0x10] sm:$0xff]  ;;  %v58_v42 = vlaneseq  ;;  %vm424_vm2 = vcmask 261120  }
   0x2   :  { %v2421_v4 = vpack.c.bf16 %v52_v2, %v51_v1  ;;  %2423 = vmatprep.subr.bf16.mxu1 %v2581_v0  ;;  %2309 = vmatprep.mubr.msk.f32.mxu1 %vm2582_vm0, %v2583_v3  ;;  %v14_v5 = vld [vmem:[%s4179_s0] sm:$0xff]  ;;  %v15_v6 = vld [vmem:[%s4179_s0 + $0x8] sm:$0xff]  ;;  %v17_v8 = vld [vmem:[%s4179_s0 + $0x18] sm:$0xff] }
   0x3   :  { %v18_v9 = vld [vmem:[%s4179_s0 + $0x20] sm:$0xff]  ;;  %v19_v10 = vld [vmem:[%s4179_s0 + $0x28] sm:$0xff]  ;;  %v20_v11 = vld [vmem:[%s4179_s0 + $0x30] sm:$0xff]  ;;  %v2836_v43 = vshrl.u32 %v58_v42, 7 }
   0x4   :  { %2422 = vmatpush3.bf16.msra.mxu0 %v2421_v4  ;;  %v21_v12 = vld [vmem:[%s4179_s0 + $0x38] sm:$0xff]  ;;  %v22_v13 = vld [vmem:[%s4179_s0 + $0x40] sm:$0xff]  ;;  %v23_v14 = vld [vmem:[%s4179_s0 + $0x48] sm:$0xff] }
   0x5   :  { %v24_v15 = vld [vmem:[%s4179_s0 + $0x50] sm:$0xff]  ;;  %v25_v16 = vld [vmem:[%s4179_s0 + $0x58] sm:$0xff]  ;;  %v26_v17 = vld [vmem:[%s4179_s0 + $0x60] sm:$0xff]  ;;  %v60_v44 = vsub.s32 0, %v2836_v43 }
   0x6   :  { %v27_v18 = vld [vmem:[%s4179_s0 + $0x68] sm:$0xff]  ;;  %v28_v19 = vld [vmem:[%s4179_s0 + $0x70] sm:$0xff]  ;;  %v29_v20 = vld [vmem:[%s4179_s0 + $0x78] sm:$0xff] }
   0x7   :  { %2191 = vmatmul.mubr.msk.f32.vlgmr.msra.gmra.mrb[0].mxu0 %vm62_vm1, %v14_v5  ;;  %v30_v21 = vld [vmem:[%s4179_s0 + $0x80] sm:$0xff]  ;;  %v31_v22 = vld [vmem:[%s4179_s0 + $0x88] sm:$0xff]  ;;  %v32_v23 = vld [vmem:[%s4179_s0 + $0x90] sm:$0xff] }
   0x8   :  { %2193 = vmatprep.mubr.msk.f32.mxu0 %vm2582_vm0, %v2583_v3  ;;  %v33_v24 = vld [vmem:[%s4179_s0 + $0x98] sm:$0xff]  ;;  %v34_v25 = vld [vmem:[%s4179_s0 + $0xa0] sm:$0xff]  ;;  %v35_v26 = vld [vmem:[%s4179_s0 + $0xa8] sm:$0xff] }
   0x9   :  { %v36_v27 = vld [vmem:[%s4179_s0 + $0xb0] sm:$0xff]  ;;  %v37_v28 = vld [vmem:[%s4179_s0 + $0xb8] sm:$0xff]  ;;  %v38_v29 = vld [vmem:[%s4179_s0 + $0xc0] sm:$0xff] }
   0xa   :  { %v39_v30 = vld [vmem:[%s4179_s0 + $0xc8] sm:$0xff]  ;;  %v40_v31 = vld [vmem:[%s4179_s0 + $0xd0] sm:$0xff]  ;;  %v41_v32 = vld [vmem:[%s4179_s0 + $0xd8] sm:$0xff] }
   0xb   :  { %2194 = vmatmul.mubr.msk.f32.gmra.mrb[2].mxu0 %vm62_vm1, %v15_v6  ;;  %v42_v33 = vld [vmem:[%s4179_s0 + $0xe0] sm:$0xff]  ;;  %v43_v34 = vld [vmem:[%s4179_s0 + $0xe8] sm:$0xff]  ;;  %v44_v35 = vld [vmem:[%s4179_s0 + $0xf0] sm:$0xff] }
   0xc   :  { %2196 = vmatprep.mubr.msk.f32.mxu0 %vm2582_vm0, %v2583_v3  ;;  %v45_v36 = vld [vmem:[%s4179_s0 + $0xf8] sm:$0xff]  ;;  %v46_v37 = vld [vmem:[%s4179_s0 + $0x100] sm:$0xff]  ;;  %v47_v38 = vld [vmem:[%s4179_s0 + $0x108] sm:$0xff] }
   0xd   :  { %v48_v39 = vld [vmem:[%s4179_s0 + $0x110] sm:$0xff]  ;;  %v49_v40 = vld [vmem:[%s4179_s0 + $0x118] sm:$0xff]  ;;  %v50_v41 = vld [vmem:[%s4179_s0 + $0x120] sm:$0xff] }
   0xe   :  { %v2842_v45 = vld [vmem:[%s4180_s2] sm:$0x3f] }
   0xf   :  { %2197 = vmatmul.mubr.msk.f32.gmra.mrb[4].mxu0 %vm62_vm1, %v16_v7  ;;  %v2845_v46 = vrot.slane %v2842_v45, %v60_v44 }
  0x10   :  { %2199 = vmatprep.mubr.msk.f32.mxu0 %vm2582_vm0, %v2583_v3 }
  0x13   :  { %2200 = vmatmul.mubr.msk.f32.gmra.mrb[6].mxu0 %vm62_vm1, %v17_v8 }
  0x14   :  { %2202 = vmatprep.mubr.msk.f32.mxu0 %vm2582_vm0, %v2583_v3 }
  0x17   :  { %2203 = vmatmul.mubr.msk.f32.gmra.mrb[8].mxu0 %vm62_vm1, %v18_v9 }
  0x18   :  { %2205 = vmatprep.mubr.msk.f32.mxu0 %vm2582_vm0, %v2583_v3 }
  0x1b   :  { %2206 = vmatmul.mubr.msk.f32.gmra.mrb[10].mxu0 %vm62_vm1, %v19_v10 }
  0x1c   :  { %2208 = vmatprep.mubr.msk.f32.mxu0 %vm2582_vm0, %v2583_v3 }
  0x1f   :  { %2209 = vmatmul.mubr.msk.f32.gmra.mrb[12].mxu0 %vm62_vm1, %v20_v11 }
  0x20   :  { %2211 = vmatprep.mubr.msk.f32.mxu0 %vm2582_vm0, %v2583_v3 }
  0x23   :  { %2212 = vmatmul.mubr.msk.f32.gmra.mrb[14].mxu0 %vm62_vm1, %v21_v12 }
  0x24   :  { %2214 = vmatprep.mubr.msk.f32.mxu0 %vm2582_vm0, %v2583_v3 }
  0x27   :  { %2215 = vmatmul.mubr.msk.f32.gmra.mrb[16].mxu0 %vm62_vm1, %v22_v13 }
  0x28   :  { %2217 = vmatprep.mubr.msk.f32.mxu0 %vm2582_vm0, %v2583_v3 }
  0x2b   :  { %2218 = vmatmul.mubr.msk.f32.gmra.mrb[18].mxu0 %vm62_vm1, %v23_v14 }
  0x2c   :  { %2220 = vmatprep.mubr.msk.f32.mxu0 %vm2582_vm0, %v2583_v3 }
  0x2f   :  { %2221 = vmatmul.mubr.msk.f32.gmra.mrb[20].mxu0 %vm62_vm1, %v24_v15 }
  0x30   :  { %2223 = vmatprep.mubr.msk.f32.mxu0 %vm2582_vm0, %v2583_v3 }
  0x33   :  { %2224 = vmatmul.mubr.msk.f32.gmra.mrb[22].mxu0 %vm62_vm1, %v25_v16 }
  0x34   :  { %2226 = vmatprep.mubr.msk.f32.mxu0 %vm2582_vm0, %v2583_v3 }
  0x37   :  { %2227 = vmatmul.mubr.msk.f32.gmra.mrb[24].mxu0 %vm62_vm1, %v26_v17 }
  0x38   :  { %2229 = vmatprep.mubr.msk.f32.mxu0 %vm2582_vm0, %v2583_v3 }
  0x3b   :  { %2230 = vmatmul.mubr.msk.f32.gmra.mrb[26].mxu0 %vm62_vm1, %v27_v18 }
  0x3c   :  { %2232 = vmatprep.mubr.msk.f32.mxu0 %vm2582_vm0, %v2583_v3 }
  0x3f   :  { %2233 = vmatmul.mubr.msk.f32.gmra.mrb[28].mxu0 %vm62_vm1, %v28_v19 }
  0x40   :  { %2235 = vmatprep.mubr.msk.f32.mxu0 %vm2582_vm0, %v2583_v3 }
  0x43   :  { %2236 = vmatmul.mubr.msk.f32.gmra.mrb[30].mxu0 %vm62_vm1, %v29_v20 }
  0x44   :  { %2238 = vmatprep.mubr.msk.f32.mxu0 %vm2582_vm0, %v2583_v3 }
  0x47   :  { %2239 = vmatmul.mubr.msk.f32.gmra.mrb[32].mxu0 %vm62_vm1, %v30_v21 }
  0x48   :  { %2241 = vmatprep.mubr.msk.f32.mxu0 %vm2582_vm0, %v2583_v3 }
  0x4b   :  { %2242 = vmatmul.mubr.msk.f32.gmra.mrb[34].mxu0 %vm62_vm1, %v31_v22 }
  0x4c   :  { %2244 = vmatprep.mubr.msk.f32.mxu0 %vm2582_vm0, %v2583_v3 }
  0x4f   :  { %2245 = vmatmul.mubr.msk.f32.gmra.mrb[36].mxu0 %vm62_vm1, %v32_v23 }
  0x50   :  { %2247 = vmatprep.mubr.msk.f32.mxu0 %vm2582_vm0, %v2583_v3 }
  0x53   :  { %2248 = vmatmul.mubr.msk.f32.gmra.mrb[38].mxu0 %vm62_vm1, %v33_v24 }
  0x54   :  { %2250 = vmatprep.mubr.msk.f32.mxu0 %vm2582_vm0, %v2583_v3 }
  0x57   :  { %2251 = vmatmul.mubr.msk.f32.gmra.mrb[40].mxu0 %vm62_vm1, %v34_v25 }
  0x58   :  { %2253 = vmatprep.mubr.msk.f32.mxu0 %vm2582_vm0, %v2583_v3 }
  0x5b   :  { %2254 = vmatmul.mubr.msk.f32.gmra.mrb[42].mxu0 %vm62_vm1, %v35_v26 }
  0x5c   :  { %2256 = vmatprep.mubr.msk.f32.mxu0 %vm2582_vm0, %v2583_v3 }
  0x5f   :  { %2257 = vmatmul.mubr.msk.f32.gmra.mrb[44].mxu0 %vm62_vm1, %v36_v27 }
  0x60   :  { %2259 = vmatprep.mubr.msk.f32.mxu0 %vm2582_vm0, %v2583_v3 }
  0x63   :  { %2260 = vmatmul.mubr.msk.f32.gmra.mrb[46].mxu0 %vm62_vm1, %v37_v28 }
  0x64   :  { %2262 = vmatprep.mubr.msk.f32.mxu0 %vm2582_vm0, %v2583_v3 }
  0x67   :  { %2263 = vmatmul.mubr.msk.f32.gmra.mrb[48].mxu0 %vm62_vm1, %v38_v29 }
  0x68   :  { %2265 = vmatprep.mubr.msk.f32.mxu0 %vm2582_vm0, %v2583_v3 }
  0x6b   :  { %2266 = vmatmul.mubr.msk.f32.gmra.mrb[50].mxu0 %vm62_vm1, %v39_v30 }
  0x6c   :  { %2268 = vmatprep.mubr.msk.f32.mxu0 %vm2582_vm0, %v2583_v3 }
  0x6f   :  { %2269 = vmatmul.mubr.msk.f32.gmra.mrb[52].mxu0 %vm62_vm1, %v40_v31 }
  0x70   :  { %2271 = vmatprep.mubr.msk.f32.mxu0 %vm2582_vm0, %v2583_v3 }
  0x73   :  { %2272 = vmatmul.mubr.msk.f32.gmra.mrb[54].mxu0 %vm62_vm1, %v41_v32 }
  0x74   :  { %2274 = vmatprep.mubr.msk.f32.mxu0 %vm2582_vm0, %v2583_v3 }
  0x77   :  { %2275 = vmatmul.mubr.msk.f32.gmra.mrb[56].mxu0 %vm62_vm1, %v42_v33 }
  0x78   :  { %2277 = vmatprep.mubr.msk.f32.mxu0 %vm2582_vm0, %v2583_v3 }
  0x7b   :  { %2278 = vmatmul.mubr.msk.f32.gmra.mrb[58].mxu0 %vm62_vm1, %v43_v34 }
  0x7c   :  { %2280 = vmatprep.mubr.msk.f32.mxu0 %vm2582_vm0, %v2583_v3 }
  0x7f   :  { %2281 = vmatmul.mubr.msk.f32.gmra.mrb[60].mxu0 %vm62_vm1, %v44_v35 }
  0x80   :  { %2283 = vmatprep.mubr.msk.f32.mxu0 %vm2582_vm0, %v2583_v3 }
  0x83   :  { %2284 = vmatmul.mubr.msk.f32.gmra.mrb[62].mxu0 %vm62_vm1, %v45_v36 }
  0x84   :  { %2286 = vmatprep.mubr.msk.f32.mxu0 %vm2582_vm0, %v2583_v3 }
  0x87   :  { %2287 = vmatmul.mubr.msk.f32.gmra.mrb[64].mxu0 %vm62_vm1, %v46_v37 }
  0x88   :  { %2289 = vmatprep.mubr.msk.f32.mxu0 %vm2582_vm0, %v2583_v3 }
  0x8b   :  { %2290 = vmatmul.mubr.msk.f32.gmra.mrb[66].mxu0 %vm62_vm1, %v47_v38 }
  0x8c   :  { %2292 = vmatprep.mubr.msk.f32.mxu0 %vm2582_vm0, %v2583_v3 }
  0x8f   :  { %2293 = vmatmul.mubr.msk.f32.gmra.mrb[68].mxu0 %vm62_vm1, %v48_v39 }
  0x90   :  { %2295 = vmatprep.mubr.msk.f32.mxu0 %vm2582_vm0, %v2583_v3 }
  0x93   :  { %2296 = vmatmul.mubr.msk.f32.gmra.mrb[70].mxu0 %vm62_vm1, %v49_v40 }
  0x94   :  { %2298 = vmatprep.mubr.msk.f32.mxu0 %vm2582_vm0, %v2583_v3 }
  0x97   :  { %2299 = vmatmul.mubr.msk.f32.gmra.mrb[72].mxu0 %vm62_vm1, %v50_v41 }
  0xda   :  { %v240_v47 = vpop.f32.mrb[0].mxu0 }
  0xdb   :  { %v2848_v48 = vadd.f32 %v240_v47, %v2845_v46  ;;  %v2192_v49 = vpop.f32.mrb[1].mxu0 }
  0xdd   :  { %v425_v50 = vsel %vm424_vm2, %v2848_v48, 0.0 }
  0xde   :  { %426 = vadd.xlane.f32.xlu0 %v425_v50  ;;  %v245_v51 = vpop.f32.mrb[2].mxu0 }
  0xdf   :  { %v2853_v52 = vadd.f32 %v245_v51, %v2845_v46  ;;  %v2195_v53 = vpop.f32.mrb[3].mxu0 }
  0xe1   :  { %v428_v54 = vsel %vm424_vm2, %v2853_v52, 0.0 }
  0xe2   :  { %429 = vadd.xlane.f32.xlu0 %v428_v54  ;;  %v250_v55 = vpop.f32.mrb[4].mxu0 }
  0xe3   :  { %v2858_v56 = vadd.f32 %v250_v55, %v2845_v46  ;;  %v2198_v57 = vpop.f32.mrb[5].mxu0 }
  0xe5   :  { %v431_v58 = vsel %vm424_vm2, %v2858_v56, 0.0 }
  0xe6   :  { %432 = vadd.xlane.f32.xlu1 %v431_v58  ;;  %v255_v59 = vpop.f32.mrb[6].mxu0 }
  0xe7   :  { %v2863_v60 = vadd.f32 %v255_v59, %v2845_v46  ;;  %v2201_v61 = vpop.f32.mrb[7].mxu0 }
  0xe9   :  { %v434_v62 = vsel %vm424_vm2, %v2863_v60, 0.0 }
  0xea   :  { %435 = vadd.xlane.f32.xlu1 %v434_v62  ;;  %v260_v63 = vpop.f32.mrb[8].mxu0 }
  0xeb   :  { %v2868_v1 = vadd.f32 %v260_v63, %v2845_v46  ;;  %v2204_v2 = vpop.f32.mrb[9].mxu0 }
  0xed   :  { %v437_v4 = vsel %vm424_vm2, %v2868_v1, 0.0 }
  0xee   :  { %438 = vadd.xlane.f32.xlu0 %v437_v4  ;;  %v265_v5 = vpop.f32.mrb[10].mxu0 }
  0xef   :  { %v2873_v6 = vadd.f32 %v265_v5, %v2845_v46  ;;  %v2207_v7 = vpop.f32.mrb[11].mxu0 }
  0xf1   :  { %v440_v8 = vsel %vm424_vm2, %v2873_v6, 0.0 }
  0xf2   :  { %441 = vadd.xlane.f32.xlu1 %v440_v8  ;;  %v270_v9 = vpop.f32.mrb[12].mxu0 }
  0xf3   :  { %v2878_v10 = vadd.f32 %v270_v9, %v2845_v46  ;;  %v2210_v11 = vpop.f32.mrb[13].mxu0 }
  0xf5   :  { %v443_v12 = vsel %vm424_vm2, %v2878_v10, 0.0 }
  0xf6   :  { %444 = vadd.xlane.f32.xlu0 %v443_v12  ;;  %v275_v13 = vpop.f32.mrb[14].mxu0 }
  0xf7   :  { %v2883_v14 = vadd.f32 %v275_v13, %v2845_v46  ;;  %v2213_v15 = vpop.f32.mrb[15].mxu0 }
  0xf9   :  { %v446_v16 = vsel %vm424_vm2, %v2883_v14, 0.0 }
  0xfa   :  { %447 = vadd.xlane.f32.xlu1 %v446_v16  ;;  %v280_v17 = vpop.f32.mrb[16].mxu0 }
  0xfb   :  { %v2888_v18 = vadd.f32 %v280_v17, %v2845_v46  ;;  %v2216_v19 = vpop.f32.mrb[17].mxu0 }
  0xfd   :  { %v449_v20 = vsel %vm424_vm2, %v2888_v18, 0.0 }
  0xfe   :  { %450 = vadd.xlane.f32.xlu0 %v449_v20  ;;  %v285_v21 = vpop.f32.mrb[18].mxu0 }
  0xff   :  { %v2893_v22 = vadd.f32 %v285_v21, %v2845_v46  ;;  %v2219_v23 = vpop.f32.mrb[19].mxu0 }
 0x101   :  { %v452_v24 = vsel %vm424_vm2, %v2893_v22, 0.0 }
 0x102   :  { %453 = vadd.xlane.f32.xlu1 %v452_v24  ;;  %v290_v25 = vpop.f32.mrb[20].mxu0 }
 0x103   :  { %v2898_v26 = vadd.f32 %v290_v25, %v2845_v46  ;;  %v2222_v27 = vpop.f32.mrb[21].mxu0 }
 0x105   :  { %v455_v28 = vsel %vm424_vm2, %v2898_v26, 0.0 }
 0x106   :  { %456 = vadd.xlane.f32.xlu0 %v455_v28  ;;  %v295_v29 = vpop.f32.mrb[22].mxu0 }
 0x107   :  { %v2903_v30 = vadd.f32 %v295_v29, %v2845_v46  ;;  %v2225_v31 = vpop.f32.mrb[23].mxu0 }
 0x109   :  { %v458_v32 = vsel %vm424_vm2, %v2903_v30, 0.0 }
 0x10a   :  { %459 = vadd.xlane.f32.xlu1 %v458_v32  ;;  %v300_v33 = vpop.f32.mrb[24].mxu0 }
 0x10b   :  { %v2908_v34 = vadd.f32 %v300_v33, %v2845_v46  ;;  %v2228_v35 = vpop.f32.mrb[25].mxu0 }
 0x10d   :  { %v461_v36 = vsel %vm424_vm2, %v2908_v34, 0.0 }
 0x10e   :  { %462 = vadd.xlane.f32.xlu0 %v461_v36  ;;  %v305_v37 = vpop.f32.mrb[26].mxu0 }
 0x10f   :  { %v2913_v38 = vadd.f32 %v305_v37, %v2845_v46  ;;  %v2231_v39 = vpop.f32.mrb[27].mxu0 }
 0x111   :  { %v464_v40 = vsel %vm424_vm2, %v2913_v38, 0.0 }
 0x112   :  { %465 = vadd.xlane.f32.xlu1 %v464_v40  ;;  %v310_v41 = vpop.f32.mrb[28].mxu0 }
 0x113   :  { %v2918_v42 = vadd.f32 %v310_v41, %v2845_v46  ;;  %v2234_v44 = vpop.f32.mrb[29].mxu0 }
 0x115   :  { %v467_v47 = vsel %vm424_vm2, %v2918_v42, 0.0 }
 0x116   :  { %468 = vadd.xlane.f32.xlu0 %v467_v47  ;;  %v315_v49 = vpop.f32.mrb[30].mxu0 }
 0x117   :  { %v2923_v50 = vadd.f32 %v315_v49, %v2845_v46  ;;  %v2237_v51 = vpop.f32.mrb[31].mxu0 }
 0x119   :  { %v470_v53 = vsel %vm424_vm2, %v2923_v50, 0.0 }
 0x11a   :  { %471 = vadd.xlane.f32.xlu1 %v470_v53  ;;  %v320_v54 = vpop.f32.mrb[32].mxu0 }
 0x11b   :  { %v2928_v55 = vadd.f32 %v320_v54, %v2845_v46  ;;  %v2240_v57 = vpop.f32.mrb[33].mxu0 }
 0x11d   :  { %v473_v58 = vsel %vm424_vm2, %v2928_v55, 0.0 }
 0x11e   :  { %474 = vadd.xlane.f32.xlu0 %v473_v58  ;;  %v325_v59 = vpop.f32.mrb[34].mxu0 }
 0x11f   :  { %v2933_v61 = vadd.f32 %v325_v59, %v2845_v46  ;;  %v2243_v62 = vpop.f32.mrb[35].mxu0 }
 0x121   :  { %v476_v63 = vsel %vm424_vm2, %v2933_v61, 0.0 }
 0x122   :  { %477 = vadd.xlane.f32.xlu1 %v476_v63  ;;  %v330_v2 = vpop.f32.mrb[36].mxu0 }
 0x123   :  { %v2938_v4 = vadd.f32 %v330_v2, %v2845_v46  ;;  %v2246_v5 = vpop.f32.mrb[37].mxu0 }
 0x125   :  { %v479_v7 = vsel %vm424_vm2, %v2938_v4, 0.0 }
 0x126   :  { %480 = vadd.xlane.f32.xlu0 %v479_v7  ;;  %v335_v8 = vpop.f32.mrb[38].mxu0 }
 0x127   :  { %v2943_v9 = vadd.f32 %v335_v8, %v2845_v46  ;;  %v2249_v11 = vpop.f32.mrb[39].mxu0 }
 0x129   :  { %v482_v12 = vsel %vm424_vm2, %v2943_v9, 0.0 }
 0x12a   :  { %483 = vadd.xlane.f32.xlu1 %v482_v12  ;;  %v340_v13 = vpop.f32.mrb[40].mxu0 }
 0x12b   :  { %v2948_v15 = vadd.f32 %v340_v13, %v2845_v46  ;;  %v2252_v16 = vpop.f32.mrb[41].mxu0 }
 0x12d   :  { %v485_v17 = vsel %vm424_vm2, %v2948_v15, 0.0 }
 0x12e   :  { %486 = vadd.xlane.f32.xlu1 %v485_v17  ;;  %v345_v19 = vpop.f32.mrb[42].mxu0 }
 0x12f   :  { %v2953_v20 = vadd.f32 %v345_v19, %v2845_v46  ;;  %v2255_v21 = vpop.f32.mrb[43].mxu0 }
 0x131   :  { %v488_v23 = vsel %vm424_vm2, %v2953_v20, 0.0 }
 0x132   :  { %489 = vadd.xlane.f32.xlu1 %v488_v23  ;;  %v350_v24 = vpop.f32.mrb[44].mxu0 }
 0x133   :  { %v2958_v25 = vadd.f32 %v350_v24, %v2845_v46  ;;  %v2258_v27 = vpop.f32.mrb[45].mxu0 }
 0x135   :  { %v491_v28 = vsel %vm424_vm2, %v2958_v25, 0.0 }
 0x136   :  { %492 = vadd.xlane.f32.xlu1 %v491_v28  ;;  %v355_v29 = vpop.f32.mrb[46].mxu0 }
 0x137   :  { %v2963_v31 = vadd.f32 %v355_v29, %v2845_v46  ;;  %v2261_v32 = vpop.f32.mrb[47].mxu0 }
 0x139   :  { %v494_v33 = vsel %vm424_vm2, %v2963_v31, 0.0 }
 0x13a   :  { %495 = vadd.xlane.f32.xlu1 %v494_v33  ;;  %v360_v35 = vpop.f32.mrb[48].mxu0 }
 0x13b   :  { %v2968_v36 = vadd.f32 %v360_v35, %v2845_v46  ;;  %v2264_v37 = vpop.f32.mrb[49].mxu0 }
 0x13d   :  { %v497_v39 = vsel %vm424_vm2, %v2968_v36, 0.0 }
 0x13e   :  { %498 = vadd.xlane.f32.xlu1 %v497_v39  ;;  %v365_v40 = vpop.f32.mrb[50].mxu0 }
 0x13f   :  { %v2973_v41 = vadd.f32 %v365_v40, %v2845_v46  ;;  %v2267_v44 = vpop.f32.mrb[51].mxu0 }
 0x141   :  { %v500_v47 = vsel %vm424_vm2, %v2973_v41, 0.0 }
 0x142   :  { %501 = vadd.xlane.f32.xlu1 %v500_v47  ;;  %v370_v49 = vpop.f32.mrb[52].mxu0 }
 0x143   :  { %v2978_v51 = vadd.f32 %v370_v49, %v2845_v46  ;;  %v2270_v53 = vpop.f32.mrb[53].mxu0 }
 0x145   :  { %v503_v54 = vsel %vm424_vm2, %v2978_v51, 0.0 }
 0x146   :  { %504 = vadd.xlane.f32.xlu1 %v503_v54  ;;  %v375_v57 = vpop.f32.mrb[54].mxu0 }
 0x147   :  { %v2983_v58 = vadd.f32 %v375_v57, %v2845_v46  ;;  %v2273_v59 = vpop.f32.mrb[55].mxu0 }
 0x149   :  { %v506_v62 = vsel %vm424_vm2, %v2983_v58, 0.0 }
 0x14a   :  { %507 = vadd.xlane.f32.xlu1 %v506_v62  ;;  %v380_v63 = vpop.f32.mrb[56].mxu0 }
 0x14b   :  { %v2988_v2 = vadd.f32 %v380_v63, %v2845_v46  ;;  %v2276_v5 = vpop.f32.mrb[57].mxu0 }
 0x14d   :  { %v509_v7 = vsel %vm424_vm2, %v2988_v2, 0.0 }
 0x14e   :  { %510 = vadd.xlane.f32.xlu1 %v509_v7  ;;  %v385_v8 = vpop.f32.mrb[58].mxu0 }
 0x14f   :  { %v2993_v11 = vadd.f32 %v385_v8, %v2845_v46  ;;  %v2279_v12 = vpop.f32.mrb[59].mxu0 }
 0x151   :  { %v512_v13 = vsel %vm424_vm2, %v2993_v11, 0.0 }
 0x152   :  { %513 = vadd.xlane.f32.xlu1 %v512_v13  ;;  %v390_v16 = vpop.f32.mrb[60].mxu0 }
 0x153   :  { %v2998_v17 = vadd.f32 %v390_v16, %v2845_v46  ;;  %v2282_v19 = vpop.f32.mrb[61].mxu0 }
 0x155   :  { %v515_v21 = vsel %vm424_vm2, %v2998_v17, 0.0 }
 0x156   :  { %516 = vadd.xlane.f32.xlu1 %v515_v21  ;;  %v395_v23 = vpop.f32.mrb[62].mxu0 }
 0x157   :  { %v3003_v24 = vadd.f32 %v395_v23, %v2845_v46  ;;  %v2285_v27 = vpop.f32.mrb[63].mxu0 }
 0x159   :  { %v518_v28 = vsel %vm424_vm2, %v3003_v24, 0.0 }
 0x15a   :  { %519 = vadd.xlane.f32.xlu1 %v518_v28  ;;  %v400_v29 = vpop.f32.mrb[64].mxu0 }
 0x15b   :  { %v3008_v32 = vadd.f32 %v400_v29, %v2845_v46  ;;  %v2288_v33 = vpop.f32.mrb[65].mxu0 }
 0x15d   :  { %v521_v35 = vsel %vm424_vm2, %v3008_v32, 0.0 }
 0x15e   :  { %522 = vadd.xlane.f32.xlu1 %v521_v35  ;;  %v405_v37 = vpop.f32.mrb[66].mxu0 }
 0x15f   :  { %v3013_v39 = vadd.f32 %v405_v37, %v2845_v46  ;;  %v2291_v40 = vpop.f32.mrb[67].mxu0 }
 0x161   :  { %v524_v44 = vsel %vm424_vm2, %v3013_v39, 0.0 }
 0x162   :  { %525 = vadd.xlane.f32.xlu1 %v524_v44  ;;  %v410_v47 = vpop.f32.mrb[68].mxu0 }
 0x163   :  { %v3018_v49 = vadd.f32 %v410_v47, %v2845_v46  ;;  %v2294_v53 = vpop.f32.mrb[69].mxu0 }
 0x165   :  { %v527_v54 = vsel %vm424_vm2, %v3018_v49, 0.0 }
 0x166   :  { %528 = vadd.xlane.f32.xlu1 %v527_v54  ;;  %v415_v57 = vpop.f32.mrb[70].mxu0 }
 0x167   :  { %v3023_v59 = vadd.f32 %v415_v57, %v2845_v46  ;;  %v2297_v62 = vpop.f32.mrb[71].mxu0 }
 0x169   :  { %v530_v63 = vsel %vm424_vm2, %v3023_v59, 0.0 }
 0x16a   :  { %531 = vadd.xlane.f32.xlu1 %v530_v63  ;;  %v420_v5 = vpop.f32.mrb[72].mxu0 }
 0x16b   :  { %v3028_v7 = vadd.f32 %v420_v5, %v2845_v46  ;;  %v427_v8 = vpop.xlane.xlu0 %426  ;;  %v2300_v12 = vpop.f32.mrb[73].mxu0 }
 0x16c   :  { %v537_v13 = vmul.f32 0.03125, %v427_v8 }
 0x16d   :  { %v533_v16 = vsel %vm424_vm2, %v3028_v7, 0.0 }
 0x16e   :  { %v3033_v19 = vsub.f32 %v2848_v48, %v537_v13  ;;  %534 = vadd.xlane.f32.xlu1 %v533_v16 }
 0x16f   :  { %v430_v21 = vpop.xlane.xlu0 %429 }
 0x170   :  { %v538_v23 = vmul.f32 0.03125, %v430_v21  ;;  %v611_v27 = vmul.f32 %v3033_v19, %v3033_v19 }
 0x172   :  { %v3038_v28 = vsub.f32 %v2853_v52, %v538_v23  ;;  %v648_v46 = vsel %vm424_vm2, %v611_v27, 0.0 }
 0x173   :  { %v433_v29 = vpop.xlane.xlu1 %432  ;;  %649 = vadd.xlane.f32.xlu0 %v648_v46 }
 0x174   :  { %v539_v33 = vmul.f32 0.03125, %v433_v29  ;;  %v612_v35 = vmul.f32 %v3038_v28, %v3038_v28 }
 0x176   :  { %v3044_v48 = vsub.f32 %v2858_v56, %v539_v33  ;;  %v651_v37 = vsel %vm424_vm2, %v612_v35, 0.0 }
 0x177   :  { %v436_v40 = vpop.xlane.xlu1 %435  ;;  %652 = vadd.xlane.f32.xlu0 %v651_v37 }
 0x178   :  { %v540_v44 = vmul.f32 0.03125, %v436_v40  ;;  %v613_v52 = vmul.f32 %v3044_v48, %v3044_v48 }
 0x17a   :  { %v3050_v47 = vsub.f32 %v2863_v60, %v540_v44  ;;  %v654_v53 = vsel %vm424_vm2, %v613_v52, 0.0 }
 0x17b   :  { %v439_v54 = vpop.xlane.xlu0 %438  ;;  %655 = vadd.xlane.f32.xlu0 %v654_v53  ;;  %v53_v53 = vld [vmem:[%s4178_s1 + $0x20] sm:$0xff] }
 0x17c   :  { %v541_v57 = vmul.f32 0.03125, %v439_v54  ;;  %v614_v56 = vmul.f32 %v3050_v47, %v3050_v47 }
 0x17e   :  { %v3056_v62 = vsub.f32 %v2868_v1, %v541_v57  ;;  %v657_v63 = vsel %vm424_vm2, %v614_v56, 0.0 }
 0x17f   :  { %v442_v5 = vpop.xlane.xlu1 %441  ;;  %658 = vadd.xlane.f32.xlu0 %v657_v63 }
 0x180   :  { %v542_v8 = vmul.f32 0.03125, %v442_v5  ;;  %v615_v60 = vmul.f32 %v3056_v62, %v3056_v62 }
 0x182   :  { %v3062_v12 = vsub.f32 %v2873_v6, %v542_v8  ;;  %v660_v13 = vsel %vm424_vm2, %v615_v60, 0.0  ;;  %v55_v8 = vld [vmem:[%s4178_s1 + $0x30] sm:$0xff]  ;;  %v56_v60 = vld [vmem:[%s4178_s1 + $0x38] sm:$0xff] }
 0x183   :  { %v445_v16 = vpop.xlane.xlu0 %444  ;;  %661 = vadd.xlane.f32.xlu0 %v660_v13 }
 0x184   :  { %v543_v21 = vmul.f32 0.03125, %v445_v16  ;;  %v616_v1 = vmul.f32 %v3062_v12, %v3062_v12  ;;  %v2427_v16 = vpack.c.bf16 %v56_v60, %v55_v8 }
 0x186   :  { %v3068_v23 = vsub.f32 %v2878_v10, %v543_v21  ;;  %v663_v27 = vsel %vm424_vm2, %v616_v1, 0.0 }
 0x187   :  { %v448_v46 = vpop.xlane.xlu1 %447  ;;  %664 = vadd.xlane.f32.xlu0 %v663_v27 }
 0x188   :  { %v544_v29 = vmul.f32 0.03125, %v448_v46  ;;  %v617_v6 = vmul.f32 %v3068_v23, %v3068_v23 }
 0x18a   :  { %v3074_v33 = vsub.f32 %v2883_v14, %v544_v29  ;;  %v666_v35 = vsel %vm424_vm2, %v617_v6, 0.0  ;;  %v54_v14 = vld [vmem:[%s4178_s1 + $0x28] sm:$0xff] }
 0x18b   :  { %v451_v37 = vpop.xlane.xlu0 %450  ;;  %667 = vadd.xlane.f32.xlu0 %v666_v35  ;;  %v2424_v57 = vpack.c.bf16 %v54_v14, %v53_v53 }
 0x18c   :  { %v545_v40 = vmul.f32 0.03125, %v451_v37  ;;  %v618_v10 = vmul.f32 %v3074_v33, %v3074_v33 }
 0x18d   :  { %2425 = vmatpush3.bf16.msra.mxu1 %v2424_v57 }
 0x18e   :  { %v3080_v44 = vsub.f32 %v2888_v18, %v545_v40  ;;  %v669_v52 = vsel %vm424_vm2, %v618_v10, 0.0  ;;  %2426 = vmatprep.subr.bf16.mxu1 %v2581_v0 }
 0x18f   :  { %v454_v54 = vpop.xlane.xlu1 %453  ;;  %670 = vadd.xlane.f32.xlu0 %v669_v52 }
 0x190   :  { %v546_v56 = vmul.f32 0.03125, %v454_v54  ;;  %v619_v63 = vmul.f32 %v3080_v44, %v3080_v44 }
 0x191   :  { %2428 = vmatpush3.bf16.msra.mxu1 %v2427_v16 }
 0x192   :  { %v3092_v18 = vsub.f32 %v2893_v22, %v546_v56  ;;  %v672_v5 = vsel %vm424_vm2, %v619_v63, 0.0 }
 0x193   :  { %v457_v13 = vpop.xlane.xlu0 %456  ;;  %673 = vadd.xlane.f32.xlu0 %v672_v5 }
 0x194   :  { %v547_v21 = vmul.f32 0.03125, %v457_v13  ;;  %v620_v22 = vmul.f32 %v3092_v18, %v3092_v18 }
 0x196   :  { %v3105_v1 = vsub.f32 %v2898_v26, %v547_v21  ;;  %v675_v0 = vsel %vm424_vm2, %v620_v22, 0.0 }
 0x197   :  { %v460_v27 = vpop.xlane.xlu1 %459  ;;  %676 = vadd.xlane.f32.xlu0 %v675_v0 }
 0x198   :  { %v548_v46 = vmul.f32 0.03125, %v460_v27  ;;  %v621_v29 = vmul.f32 %v3105_v1, %v3105_v1 }
 0x19a   :  { %v3111_v6 = vsub.f32 %v2903_v30, %v548_v46  ;;  %v678_v35 = vsel %vm424_vm2, %v621_v29, 0.0 }
 0x19b   :  { %v463_v37 = vpop.xlane.xlu0 %462  ;;  %679 = vadd.xlane.f32.xlu0 %v678_v35 }
 0x19c   :  { %v549_v40 = vmul.f32 0.03125, %v463_v37  ;;  %v622_v26 = vmul.f32 %v3111_v6, %v3111_v6 }
 0x19e   :  { %v3117_v10 = vsub.f32 %v2908_v34, %v549_v40  ;;  %v681_v52 = vsel %vm424_vm2, %v622_v26, 0.0 }
 0x19f   :  { %v466_v53 = vpop.xlane.xlu1 %465  ;;  %682 = vadd.xlane.f32.xlu0 %v681_v52 }
 0x1a0   :  { %v550_v14 = vmul.f32 0.03125, %v466_v53  ;;  %v623_v30 = vmul.f32 %v3117_v10, %v3117_v10 }
 0x1a2   :  { %v3123_v54 = vsub.f32 %v2913_v38, %v550_v14  ;;  %v684_v57 = vsel %vm424_vm2, %v623_v30, 0.0 }
 0x1a3   :  { %v469_v56 = vpop.xlane.xlu0 %468  ;;  %685 = vadd.xlane.f32.xlu0 %v684_v57 }
 0x1a4   :  { %v551_v63 = vmul.f32 0.03125, %v469_v56  ;;  %v624_v34 = vmul.f32 %v3123_v54, %v3123_v54 }
 0x1a6   :  { %v3129_v5 = vsub.f32 %v2918_v42, %v551_v63  ;;  %v687_v8 = vsel %vm424_vm2, %v624_v34, 0.0 }
 0x1a7   :  { %v472_v60 = vpop.xlane.xlu1 %471  ;;  %688 = vadd.xlane.f32.xlu0 %v687_v8 }
 0x1a8   :  { %v552_v13 = vmul.f32 0.03125, %v472_v60  ;;  %v625_v38 = vmul.f32 %v3129_v5, %v3129_v5 }
 0x1aa   :  { %v3135_v16 = vsub.f32 %v2923_v50, %v552_v13  ;;  %v690_v21 = vsel %vm424_vm2, %v625_v38, 0.0 }
 0x1ab   :  { %v475_v22 = vpop.xlane.xlu0 %474  ;;  %691 = vadd.xlane.f32.xlu0 %v690_v21 }
 0x1ac   :  { %v553_v0 = vmul.f32 0.03125, %v475_v22  ;;  %v626_v42 = vmul.f32 %v3135_v16, %v3135_v16 }
 0x1ae   :  { %v3141_v27 = vsub.f32 %v2928_v55, %v553_v0  ;;  %v693_v46 = vsel %vm424_vm2, %v626_v42, 0.0 }
 0x1af   :  { %v478_v29 = vpop.xlane.xlu1 %477  ;;  %694 = vadd.xlane.f32.xlu0 %v693_v46 }
 0x1b0   :  { %v554_v35 = vmul.f32 0.03125, %v478_v29  ;;  %v627_v50 = vmul.f32 %v3141_v27, %v3141_v27 }
 0x1b2   :  { %v3147_v37 = vsub.f32 %v2933_v61, %v554_v35  ;;  %v696_v40 = vsel %vm424_vm2, %v627_v50, 0.0 }
 0x1b3   :  { %697 = vadd.xlane.f32.xlu0 %v696_v40  ;;  %v481_v26 = vpop.xlane.xlu0 %480 }
 0x1b4   :  { %v555_v52 = vmul.f32 0.03125, %v481_v26  ;;  %v628_v55 = vmul.f32 %v3147_v37, %v3147_v37 }
 0x1b6   :  { %v3153_v53 = vsub.f32 %v2938_v4, %v555_v52  ;;  %v699_v14 = vsel %vm424_vm2, %v628_v55, 0.0 }
 0x1b7   :  { %700 = vadd.xlane.f32.xlu0 %v699_v14  ;;  %v484_v30 = vpop.xlane.xlu1 %483 }
 0x1b8   :  { %v556_v57 = vmul.f32 0.03125, %v484_v30  ;;  %v629_v61 = vmul.f32 %v3153_v53, %v3153_v53 }
 0x1ba   :  { %v3159_v56 = vsub.f32 %v2943_v9, %v556_v57  ;;  %v702_v63 = vsel %vm424_vm2, %v629_v61, 0.0 }
 0x1bb   :  { %v487_v34 = vpop.xlane.xlu1 %486  ;;  %703 = vadd.xlane.f32.xlu1 %v702_v63 }
 0x1bc   :  { %v557_v8 = vmul.f32 0.03125, %v487_v34  ;;  %v630_v4 = vmul.f32 %v3159_v56, %v3159_v56 }
 0x1be   :  { %v3165_v60 = vsub.f32 %v2948_v15, %v557_v8  ;;  %v705_v13 = vsel %vm424_vm2, %v630_v4, 0.0 }
 0x1bf   :  { %706 = vadd.xlane.f32.xlu0 %v705_v13  ;;  %v490_v38 = vpop.xlane.xlu1 %489 }
 0x1c0   :  { %v558_v21 = vmul.f32 0.03125, %v490_v38  ;;  %v631_v9 = vmul.f32 %v3165_v60, %v3165_v60 }
 0x1c2   :  { %v3171_v22 = vsub.f32 %v2953_v20, %v558_v21  ;;  %v708_v0 = vsel %vm424_vm2, %v631_v9, 0.0 }
 0x1c3   :  { %v493_v42 = vpop.xlane.xlu1 %492  ;;  %709 = vadd.xlane.f32.xlu1 %v708_v0 }
 0x1c4   :  { %v559_v46 = vmul.f32 0.03125, %v493_v42  ;;  %v632_v15 = vmul.f32 %v3171_v22, %v3171_v22 }
 0x1c6   :  { %v3177_v29 = vsub.f32 %v2958_v25, %v559_v46  ;;  %v711_v35 = vsel %vm424_vm2, %v632_v15, 0.0 }
 0x1c7   :  { %712 = vadd.xlane.f32.xlu0 %v711_v35  ;;  %v496_v50 = vpop.xlane.xlu1 %495 }
 0x1c8   :  { %v560_v40 = vmul.f32 0.03125, %v496_v50  ;;  %v633_v20 = vmul.f32 %v3177_v29, %v3177_v29 }
 0x1ca   :  { %v3183_v26 = vsub.f32 %v2963_v31, %v560_v40  ;;  %v714_v52 = vsel %vm424_vm2, %v633_v20, 0.0 }
 0x1cb   :  { %v499_v55 = vpop.xlane.xlu1 %498  ;;  %715 = vadd.xlane.f32.xlu1 %v714_v52 }
 0x1cc   :  { %v561_v14 = vmul.f32 0.03125, %v499_v55  ;;  %v634_v25 = vmul.f32 %v3183_v26, %v3183_v26 }
 0x1ce   :  { %v3189_v30 = vsub.f32 %v2968_v36, %v561_v14  ;;  %v717_v57 = vsel %vm424_vm2, %v634_v25, 0.0 }
 0x1cf   :  { %718 = vadd.xlane.f32.xlu0 %v717_v57  ;;  %v502_v61 = vpop.xlane.xlu1 %501 }
 0x1d0   :  { %v562_v63 = vmul.f32 0.03125, %v502_v61  ;;  %v635_v31 = vmul.f32 %v3189_v30, %v3189_v30 }
 0x1d2   :  { %v3195_v34 = vsub.f32 %v2973_v41, %v562_v63  ;;  %v720_v8 = vsel %vm424_vm2, %v635_v31, 0.0 }
 0x1d3   :  { %v505_v4 = vpop.xlane.xlu1 %504  ;;  %721 = vadd.xlane.f32.xlu1 %v720_v8 }
 0x1d4   :  { %v563_v13 = vmul.f32 0.03125, %v505_v4  ;;  %v636_v36 = vmul.f32 %v3195_v34, %v3195_v34 }
 0x1d6   :  { %v3201_v38 = vsub.f32 %v2978_v51, %v563_v13  ;;  %v723_v21 = vsel %vm424_vm2, %v636_v36, 0.0 }
 0x1d7   :  { %724 = vadd.xlane.f32.xlu0 %v723_v21  ;;  %v508_v9 = vpop.xlane.xlu1 %507 }
 0x1d8   :  { %v564_v0 = vmul.f32 0.03125, %v508_v9  ;;  %v637_v41 = vmul.f32 %v3201_v38, %v3201_v38 }
 0x1da   :  { %v3207_v42 = vsub.f32 %v2983_v58, %v564_v0  ;;  %v726_v46 = vsel %vm424_vm2, %v637_v41, 0.0 }
 0x1db   :  { %v511_v15 = vpop.xlane.xlu1 %510  ;;  %727 = vadd.xlane.f32.xlu1 %v726_v46 }
 0x1dc   :  { %v565_v35 = vmul.f32 0.03125, %v511_v15  ;;  %v638_v51 = vmul.f32 %v3207_v42, %v3207_v42 }
 0x1de   :  { %v3213_v50 = vsub.f32 %v2988_v2, %v565_v35  ;;  %v729_v40 = vsel %vm424_vm2, %v638_v51, 0.0 }
 0x1df   :  { %730 = vadd.xlane.f32.xlu0 %v729_v40  ;;  %v514_v20 = vpop.xlane.xlu1 %513 }
 0x1e0   :  { %v566_v52 = vmul.f32 0.03125, %v514_v20  ;;  %v639_v58 = vmul.f32 %v3213_v50, %v3213_v50 }
 0x1e2   :  { %v3219_v55 = vsub.f32 %v2993_v11, %v566_v52  ;;  %v732_v14 = vsel %vm424_vm2, %v639_v58, 0.0 }
 0x1e3   :  { %v517_v25 = vpop.xlane.xlu1 %516  ;;  %733 = vadd.xlane.f32.xlu1 %v732_v14 }
 0x1e4   :  { %v567_v57 = vmul.f32 0.03125, %v517_v25  ;;  %v640_v2 = vmul.f32 %v3219_v55, %v3219_v55 }
 0x1e6   :  { %v3225_v61 = vsub.f32 %v2998_v17, %v567_v57  ;;  %v735_v63 = vsel %vm424_vm2, %v640_v2, 0.0 }
 0x1e7   :  { %736 = vadd.xlane.f32.xlu0 %v735_v63  ;;  %v520_v31 = vpop.xlane.xlu1 %519 }
 0x1e8   :  { %v568_v8 = vmul.f32 0.03125, %v520_v31  ;;  %v641_v11 = vmul.f32 %v3225_v61, %v3225_v61 }
 0x1ea   :  { %v3231_v4 = vsub.f32 %v3003_v24, %v568_v8  ;;  %v738_v13 = vsel %vm424_vm2, %v641_v11, 0.0 }
 0x1eb   :  { %v523_v36 = vpop.xlane.xlu1 %522  ;;  %739 = vadd.xlane.f32.xlu1 %v738_v13 }
 0x1ec   :  { %v569_v21 = vmul.f32 0.03125, %v523_v36  ;;  %v642_v17 = vmul.f32 %v3231_v4, %v3231_v4 }
 0x1ee   :  { %v3237_v9 = vsub.f32 %v3008_v32, %v569_v21  ;;  %v741_v0 = vsel %vm424_vm2, %v642_v17, 0.0 }
 0x1ef   :  { %742 = vadd.xlane.f32.xlu0 %v741_v0  ;;  %v526_v41 = vpop.xlane.xlu1 %525 }
 0x1f0   :  { %v570_v46 = vmul.f32 0.03125, %v526_v41  ;;  %v643_v24 = vmul.f32 %v3237_v9, %v3237_v9 }
 0x1f2   :  { %v3243_v15 = vsub.f32 %v3013_v39, %v570_v46  ;;  %v744_v35 = vsel %vm424_vm2, %v643_v24, 0.0  ;;  %v909_v24 = vsub.s32 1, %v2836_v43 }
 0x1f3   :  { %v529_v51 = vpop.xlane.xlu1 %528  ;;  %745 = vadd.xlane.f32.xlu1 %v744_v35 }
 0x1f4   :  { %v571_v40 = vmul.f32 0.03125, %v529_v51  ;;  %v644_v32 = vmul.f32 %v3243_v15, %v3243_v15 }
 0x1f6   :  { %v3249_v20 = vsub.f32 %v3018_v49, %v571_v40  ;;  %v747_v52 = vsel %vm424_vm2, %v644_v32, 0.0  ;;  %v950_v40 = vsub.s32 2, %v2836_v43 }
 0x1f7   :  { %748 = vadd.xlane.f32.xlu0 %v747_v52  ;;  %v532_v58 = vpop.xlane.xlu1 %531  ;;  %v3270_v52 = vrot.slane %v2842_v45, %v909_v24 }
 0x1f8   :  { %v572_v14 = vmul.f32 0.03125, %v532_v58  ;;  %v645_v39 = vmul.f32 %v3249_v20, %v3249_v20 }
 0x1fa   :  { %v3255_v25 = vsub.f32 %v3023_v59, %v572_v14  ;;  %v750_v57 = vsel %vm424_vm2, %v645_v39, 0.0 }
 0x1fb   :  { %751 = vadd.xlane.f32.xlu1 %v750_v57  ;;  %v535_v2 = vpop.xlane.xlu1 %534 }
 0x1fc   :  { %v573_v63 = vmul.f32 0.03125, %v535_v2  ;;  %v646_v49 = vmul.f32 %v3255_v25, %v3255_v25  ;;  %v3274_v2 = vrot.slane %v2842_v45, %v950_v40 }
 0x1fe   :  { %v3261_v31 = vsub.f32 %v3028_v7, %v573_v63  ;;  %v753_v8 = vsel %vm424_vm2, %v646_v49, 0.0 }
 0x1ff   :  { %754 = vadd.xlane.f32.xlu0 %v753_v8 }
 0x200   :  { %v650_v11 = vpop.xlane.xlu0 %649  ;;  %v647_v13 = vmul.f32 %v3261_v31, %v3261_v31 }
 0x201   :  { %v759_v59 = vmul.f32 0.03125, %v650_v11 }
 0x202   :  { %v756_v36 = vsel %vm424_vm2, %v647_v13, 0.0 }
 0x203   :  { %v796_v21 = vadd.f32 1e-05, %v759_v59  ;;  %757 = vadd.xlane.f32.xlu1 %v756_v36 }
 0x204   :  { %v653_v17 = vpop.xlane.xlu0 %652 }
 0x205   :  { %2432 = vrsqrt.f32 %v796_v21  ;;  %v760_v0 = vmul.f32 0.03125, %v653_v17 }
 0x207   :  { %v797_v41 = vadd.f32 1e-05, %v760_v0 }
 0x208   :  { %v656_v46 = vpop.xlane.xlu0 %655 }
 0x209   :  { %2434 = vrsqrt.f32 %v797_v41  ;;  %v761_v7 = vmul.f32 0.03125, %v656_v46 }
 0x20b   :  { %v798_v35 = vadd.f32 1e-05, %v761_v7 }
 0x20c   :  { %v659_v51 = vpop.xlane.xlu0 %658 }
 0x20d   :  { %2436 = vrsqrt.f32 %v798_v35  ;;  %v762_v32 = vmul.f32 0.03125, %v659_v51 }
 0x20f   :  { %v2433_v58 = vpop.eup %2432  ;;  %v799_v14 = vadd.f32 1e-05, %v762_v32 }
 0x210   :  { %v662_v39 = vpop.xlane.xlu0 %661  ;;  %v870_v57 = vmul.f32 %v2433_v58, %v3033_v19 }
 0x211   :  { %2438 = vrsqrt.f32 %v799_v14  ;;  %v763_v63 = vmul.f32 0.03125, %v662_v39 }
 0x212   :  { %v911_v49 = vmul.f32 %v3270_v52, %v870_v57 }
 0x213   :  { %v2435_v8 = vpop.eup %2434  ;;  %v800_v11 = vadd.f32 1e-05, %v763_v63 }
 0x214   :  { %v665_v13 = vpop.xlane.xlu0 %664  ;;  %v952_v59 = vadd.f32 %v3274_v2, %v911_v49  ;;  %v871_v36 = vmul.f32 %v2435_v8, %v3038_v28 }
 0x215   :  { %2440 = vrsqrt.f32 %v800_v11  ;;  %v764_v21 = vmul.f32 0.03125, %v665_v13 }
 0x216   :  { %v989_v17 = vmax.f32 %v952_v59, 0.0  ;;  %v912_v0 = vmul.f32 %v3270_v52, %v871_v36 }
 0x217   :  { %v2437_v19 = vpop.eup %2436  ;;  %v801_v41 = vadd.f32 1e-05, %v764_v21 }
 0x218   :  { %2310 = vmatmul.mubr.msk.f32.vlgmr.msra.gmra.mrb[0].mxu1 %vm424_vm2, %v989_v17  ;;  %v668_v45 = vpop.xlane.xlu0 %667  ;;  %v953_v46 = vadd.f32 %v3274_v2, %v912_v0  ;;  %v872_v7 = vmul.f32 %v2437_v19, %v3044_v48 }
 0x219   :  { %2442 = vrsqrt.f32 %v801_v41  ;;  %v765_v24 = vmul.f32 0.03125, %v668_v45  ;;  %2312 = vmatprep.mubr.msk.f32.mxu1 %vm2582_vm0, %v2583_v3 }
 0x21a   :  { %v990_v28 = vmax.f32 %v953_v46, 0.0  ;;  %v913_v35 = vmul.f32 %v3270_v52, %v872_v7 }
 0x21b   :  { %v2439_v51 = vpop.eup %2438  ;;  %v802_v40 = vadd.f32 1e-05, %v765_v24 }
 0x21c   :  { %2313 = vmatmul.mubr.msk.f32.gmra.mrb[2].mxu1 %vm424_vm2, %v990_v28  ;;  %v671_v32 = vpop.xlane.xlu0 %670  ;;  %v954_v58 = vadd.f32 %v3274_v2, %v913_v35  ;;  %v873_v14 = vmul.f32 %v2439_v51, %v3050_v47 }
 0x21d   :  { %2444 = vrsqrt.f32 %v802_v40  ;;  %v766_v39 = vmul.f32 0.03125, %v671_v32  ;;  %2315 = vmatprep.mubr.msk.f32.mxu1 %vm2582_vm0, %v2583_v3 }
 0x21e   :  { %v991_v48 = vmax.f32 %v954_v58, 0.0  ;;  %v914_v57 = vmul.f32 %v3270_v52, %v873_v14 }
 0x21f   :  { %v2441_v63 = vpop.eup %2440  ;;  %v803_v49 = vadd.f32 1e-05, %v766_v39 }
 0x220   :  { %2316 = vmatmul.mubr.msk.f32.gmra.mrb[4].mxu1 %vm424_vm2, %v991_v48  ;;  %v674_v8 = vpop.xlane.xlu0 %673  ;;  %v955_v11 = vadd.f32 %v3274_v2, %v914_v57  ;;  %v874_v13 = vmul.f32 %v2441_v63, %v3056_v62 }
 0x221   :  { %2446 = vrsqrt.f32 %v803_v49  ;;  %v767_v59 = vmul.f32 0.03125, %v674_v8  ;;  %2318 = vmatprep.mubr.msk.f32.mxu1 %vm2582_vm0, %v2583_v3 }
 0x222   :  { %v992_v47 = vmax.f32 %v955_v11, 0.0  ;;  %v915_v36 = vmul.f32 %v3270_v52, %v874_v13 }
 0x223   :  { %v2443_v21 = vpop.eup %2442  ;;  %v804_v17 = vadd.f32 1e-05, %v767_v59 }
 0x224   :  { %2319 = vmatmul.mubr.msk.f32.gmra.mrb[6].mxu1 %vm424_vm2, %v992_v47  ;;  %v677_v0 = vpop.xlane.xlu0 %676  ;;  %v956_v19 = vadd.f32 %v3274_v2, %v915_v36  ;;  %v875_v41 = vmul.f32 %v2443_v21, %v3062_v12 }
 0x225   :  { %2448 = vrsqrt.f32 %v804_v17  ;;  %v768_v45 = vmul.f32 0.03125, %v677_v0  ;;  %2321 = vmatprep.mubr.msk.f32.mxu1 %vm2582_vm0, %v2583_v3 }
 0x226   :  { %v993_v62 = vmax.f32 %v956_v19, 0.0  ;;  %v916_v46 = vmul.f32 %v3270_v52, %v875_v41 }
 0x227   :  { %v2445_v7 = vpop.eup %2444  ;;  %v805_v24 = vadd.f32 1e-05, %v768_v45 }
 0x228   :  { %2322 = vmatmul.mubr.msk.f32.gmra.mrb[8].mxu1 %vm424_vm2, %v993_v62  ;;  %v680_v28 = vpop.xlane.xlu0 %679  ;;  %v957_v35 = vadd.f32 %v3274_v2, %v916_v46  ;;  %v876_v51 = vmul.f32 %v2445_v7, %v3068_v23 }
 0x229   :  { %2450 = vrsqrt.f32 %v805_v24  ;;  %v769_v40 = vmul.f32 0.03125, %v680_v28  ;;  %2324 = vmatprep.mubr.msk.f32.mxu1 %vm2582_vm0, %v2583_v3 }
 0x22a   :  { %v994_v12 = vmax.f32 %v957_v35, 0.0  ;;  %v917_v32 = vmul.f32 %v3270_v52, %v876_v51 }
 0x22b   :  { %v2447_v58 = vpop.eup %2446  ;;  %v806_v14 = vadd.f32 1e-05, %v769_v40 }
 0x22c   :  { %2325 = vmatmul.mubr.msk.f32.gmra.mrb[10].mxu1 %vm424_vm2, %v994_v12  ;;  %v683_v39 = vpop.xlane.xlu0 %682  ;;  %v958_v48 = vadd.f32 %v3274_v2, %v917_v32  ;;  %v877_v57 = vmul.f32 %v2447_v58, %v3074_v33 }
 0x22d   :  { %2452 = vrsqrt.f32 %v806_v14  ;;  %v770_v63 = vmul.f32 0.03125, %v683_v39  ;;  %2327 = vmatprep.mubr.msk.f32.mxu1 %vm2582_vm0, %v2583_v3 }
 0x22e   :  { %v995_v23 = vmax.f32 %v958_v48, 0.0  ;;  %v918_v49 = vmul.f32 %v3270_v52, %v877_v57 }
 0x22f   :  { %v2449_v8 = vpop.eup %2448  ;;  %v807_v11 = vadd.f32 1e-05, %v770_v63 }
 0x230   :  { %2328 = vmatmul.mubr.msk.f32.gmra.mrb[12].mxu1 %vm424_vm2, %v995_v23  ;;  %v686_v13 = vpop.xlane.xlu0 %685  ;;  %v959_v59 = vadd.f32 %v3274_v2, %v918_v49  ;;  %v878_v47 = vmul.f32 %v2449_v8, %v3080_v44 }
 0x231   :  { %2454 = vrsqrt.f32 %v807_v11  ;;  %v771_v36 = vmul.f32 0.03125, %v686_v13  ;;  %2330 = vmatprep.mubr.msk.f32.mxu1 %vm2582_vm0, %v2583_v3 }
 0x232   :  { %v996_v33 = vmax.f32 %v959_v59, 0.0  ;;  %v919_v21 = vmul.f32 %v3270_v52, %v878_v47 }
 0x233   :  { %v2451_v17 = vpop.eup %2450  ;;  %v808_v0 = vadd.f32 1e-05, %v771_v36 }
 0x234   :  { %2331 = vmatmul.mubr.msk.f32.gmra.mrb[14].mxu1 %vm424_vm2, %v996_v33  ;;  %v689_v19 = vpop.xlane.xlu0 %688  ;;  %v960_v41 = vadd.f32 %v3274_v2, %v919_v21  ;;  %v879_v45 = vmul.f32 %v2451_v17, %v3092_v18 }
 0x235   :  { %2456 = vrsqrt.f32 %v808_v0  ;;  %v772_v62 = vmul.f32 0.03125, %v689_v19  ;;  %2333 = vmatprep.mubr.msk.f32.mxu1 %vm2582_vm0, %v2583_v3 }
 0x236   :  { %v997_v44 = vmax.f32 %v960_v41, 0.0  ;;  %v920_v46 = vmul.f32 %v3270_v52, %v879_v45 }
 0x237   :  { %v2453_v7 = vpop.eup %2452  ;;  %v809_v24 = vadd.f32 1e-05, %v772_v62 }
 0x238   :  { %2334 = vmatmul.mubr.msk.f32.gmra.mrb[16].mxu1 %vm424_vm2, %v997_v44  ;;  %v692_v28 = vpop.xlane.xlu0 %691  ;;  %v961_v35 = vadd.f32 %v3274_v2, %v920_v46  ;;  %v880_v51 = vmul.f32 %v2453_v7, %v3105_v1 }
 0x239   :  { %2458 = vrsqrt.f32 %v809_v24  ;;  %v773_v40 = vmul.f32 0.03125, %v692_v28  ;;  %2336 = vmatprep.mubr.msk.f32.mxu1 %vm2582_vm0, %v2583_v3 }
 0x23a   :  { %v998_v18 = vmax.f32 %v961_v35, 0.0  ;;  %v921_v12 = vmul.f32 %v3270_v52, %v880_v51 }
 0x23b   :  { %v2455_v32 = vpop.eup %2454  ;;  %v810_v58 = vadd.f32 1e-05, %v773_v40 }
 0x23c   :  { %2337 = vmatmul.mubr.msk.f32.gmra.mrb[18].mxu1 %vm424_vm2, %v998_v18  ;;  %v695_v14 = vpop.xlane.xlu0 %694  ;;  %v962_v39 = vadd.f32 %v3274_v2, %v921_v12  ;;  %v881_v48 = vmul.f32 %v2455_v32, %v3111_v6 }
 0x23d   :  { %2460 = vrsqrt.f32 %v810_v58  ;;  %v774_v57 = vmul.f32 0.03125, %v695_v14  ;;  %2339 = vmatprep.mubr.msk.f32.mxu1 %vm2582_vm0, %v2583_v3 }
 0x23e   :  { %v999_v1 = vmax.f32 %v962_v39, 0.0  ;;  %v922_v63 = vmul.f32 %v3270_v52, %v881_v48 }
 0x23f   :  { %v2457_v23 = vpop.eup %2456  ;;  %v811_v49 = vadd.f32 1e-05, %v774_v57 }
 0x240   :  { %2340 = vmatmul.mubr.msk.f32.gmra.mrb[20].mxu1 %vm424_vm2, %v999_v1  ;;  %v698_v8 = vpop.xlane.xlu0 %697  ;;  %v963_v11 = vadd.f32 %v3274_v2, %v922_v63  ;;  %v882_v13 = vmul.f32 %v2457_v23, %v3117_v10 }
 0x241   :  { %2462 = vrsqrt.f32 %v811_v49  ;;  %v775_v59 = vmul.f32 0.03125, %v698_v8  ;;  %2342 = vmatprep.mubr.msk.f32.mxu1 %vm2582_vm0, %v2583_v3 }
 0x242   :  { %v1000_v6 = vmax.f32 %v963_v11, 0.0  ;;  %v923_v47 = vmul.f32 %v3270_v52, %v882_v13 }
 0x243   :  { %v2459_v36 = vpop.eup %2458  ;;  %v812_v33 = vadd.f32 1e-05, %v775_v59 }
 0x244   :  { %2343 = vmatmul.mubr.msk.f32.gmra.mrb[22].mxu1 %vm424_vm2, %v1000_v6  ;;  %v701_v21 = vpop.xlane.xlu0 %700  ;;  %v964_v17 = vadd.f32 %v3274_v2, %v923_v47  ;;  %v883_v0 = vmul.f32 %v2459_v36, %v3123_v54 }
 0x245   :  { %2464 = vrsqrt.f32 %v812_v33  ;;  %v776_v19 = vmul.f32 0.03125, %v701_v21  ;;  %2345 = vmatprep.mubr.msk.f32.mxu1 %vm2582_vm0, %v2583_v3 }
 0x246   :  { %v1001_v10 = vmax.f32 %v964_v17, 0.0  ;;  %v924_v41 = vmul.f32 %v3270_v52, %v883_v0 }
 0x247   :  { %v2461_v45 = vpop.eup %2460  ;;  %v813_v62 = vadd.f32 1e-05, %v776_v19 }
 0x248   :  { %2346 = vmatmul.mubr.msk.f32.gmra.mrb[24].mxu1 %vm424_vm2, %v1001_v10  ;;  %v704_v44 = vpop.xlane.xlu1 %703  ;;  %v965_v46 = vadd.f32 %v3274_v2, %v924_v41  ;;  %v884_v7 = vmul.f32 %v2461_v45, %v3129_v5 }
 0x249   :  { %2466 = vrsqrt.f32 %v813_v62  ;;  %v777_v24 = vmul.f32 0.03125, %v704_v44  ;;  %2348 = vmatprep.mubr.msk.f32.mxu1 %vm2582_vm0, %v2583_v3 }
 0x24a   :  { %v1002_v54 = vmax.f32 %v965_v46, 0.0  ;;  %v925_v28 = vmul.f32 %v3270_v52, %v884_v7 }
 0x24b   :  { %v2463_v35 = vpop.eup %2462  ;;  %v814_v51 = vadd.f32 1e-05, %v777_v24 }
 0x24c   :  { %2349 = vmatmul.mubr.msk.f32.gmra.mrb[26].mxu1 %vm424_vm2, %v1002_v54  ;;  %v707_v40 = vpop.xlane.xlu0 %706  ;;  %v966_v18 = vadd.f32 %v3274_v2, %v925_v28  ;;  %v885_v12 = vmul.f32 %v2463_v35, %v3135_v16 }
 0x24d   :  { %2468 = vrsqrt.f32 %v814_v51  ;;  %v778_v32 = vmul.f32 0.03125, %v707_v40  ;;  %2351 = vmatprep.mubr.msk.f32.mxu1 %vm2582_vm0, %v2583_v3 }
 0x24e   :  { %v1003_v5 = vmax.f32 %v966_v18, 0.0  ;;  %v926_v58 = vmul.f32 %v3270_v52, %v885_v12 }
 0x24f   :  { %v2465_v14 = vpop.eup %2464  ;;  %v815_v39 = vadd.f32 1e-05, %v778_v32 }
 0x250   :  { %2352 = vmatmul.mubr.msk.f32.gmra.mrb[28].mxu1 %vm424_vm2, %v1003_v5  ;;  %v710_v48 = vpop.xlane.xlu1 %709  ;;  %v967_v57 = vadd.f32 %v3274_v2, %v926_v58  ;;  %v886_v1 = vmul.f32 %v2465_v14, %v3141_v27 }
 0x251   :  { %2470 = vrsqrt.f32 %v815_v39  ;;  %v779_v63 = vmul.f32 0.03125, %v710_v48  ;;  %2354 = vmatprep.mubr.msk.f32.mxu1 %vm2582_vm0, %v2583_v3 }
 0x252   :  { %v1004_v16 = vmax.f32 %v967_v57, 0.0  ;;  %v927_v23 = vmul.f32 %v3270_v52, %v886_v1 }
 0x253   :  { %v2467_v49 = vpop.eup %2466  ;;  %v816_v8 = vadd.f32 1e-05, %v779_v63 }
 0x254   :  { %2355 = vmatmul.mubr.msk.f32.gmra.mrb[30].mxu1 %vm424_vm2, %v1004_v16  ;;  %v713_v11 = vpop.xlane.xlu0 %712  ;;  %v968_v13 = vadd.f32 %v3274_v2, %v927_v23  ;;  %v887_v59 = vmul.f32 %v2467_v49, %v3147_v37 }
 0x255   :  { %2472 = vrsqrt.f32 %v816_v8  ;;  %v780_v6 = vmul.f32 0.03125, %v713_v11  ;;  %2357 = vmatprep.mubr.msk.f32.mxu1 %vm2582_vm0, %v2583_v3 }
 0x256   :  { %v1005_v27 = vmax.f32 %v968_v13, 0.0  ;;  %v928_v47 = vmul.f32 %v3270_v52, %v887_v59 }
 0x257   :  { %v2469_v36 = vpop.eup %2468  ;;  %v817_v33 = vadd.f32 1e-05, %v780_v6 }
 0x258   :  { %2358 = vmatmul.mubr.msk.f32.gmra.mrb[32].mxu1 %vm424_vm2, %v1005_v27  ;;  %v716_v21 = vpop.xlane.xlu1 %715  ;;  %v969_v17 = vadd.f32 %v3274_v2, %v928_v47  ;;  %v888_v0 = vmul.f32 %v2469_v36, %v3153_v53 }
 0x259   :  { %2474 = vrsqrt.f32 %v817_v33  ;;  %v781_v19 = vmul.f32 0.03125, %v716_v21  ;;  %2360 = vmatprep.mubr.msk.f32.mxu1 %vm2582_vm0, %v2583_v3 }
 0x25a   :  { %v1006_v37 = vmax.f32 %v969_v17, 0.0  ;;  %v929_v10 = vmul.f32 %v3270_v52, %v888_v0 }
 0x25b   :  { %v2471_v41 = vpop.eup %2470  ;;  %v818_v45 = vadd.f32 1e-05, %v781_v19 }
 0x25c   :  { %2361 = vmatmul.mubr.msk.f32.gmra.mrb[34].mxu1 %vm424_vm2, %v1006_v37  ;;  %v719_v62 = vpop.xlane.xlu0 %718  ;;  %v970_v44 = vadd.f32 %v3274_v2, %v929_v10  ;;  %v889_v46 = vmul.f32 %v2471_v41, %v3159_v56 }
 0x25d   :  { %2476 = vrsqrt.f32 %v818_v45  ;;  %v782_v7 = vmul.f32 0.03125, %v719_v62  ;;  %2363 = vmatprep.mubr.msk.f32.mxu1 %vm2582_vm0, %v2583_v3 }
 0x25e   :  { %v1007_v53 = vmax.f32 %v970_v44, 0.0  ;;  %v930_v24 = vmul.f32 %v3270_v52, %v889_v46 }
 0x25f   :  { %v2473_v54 = vpop.eup %2472  ;;  %v819_v28 = vadd.f32 1e-05, %v782_v7 }
 0x260   :  { %2364 = vmatmul.mubr.msk.f32.gmra.mrb[36].mxu1 %vm424_vm2, %v1007_v53  ;;  %v722_v35 = vpop.xlane.xlu1 %721  ;;  %v971_v51 = vadd.f32 %v3274_v2, %v930_v24  ;;  %v890_v40 = vmul.f32 %v2473_v54, %v3165_v60 }
 0x261   :  { %2478 = vrsqrt.f32 %v819_v28  ;;  %v783_v18 = vmul.f32 0.03125, %v722_v35  ;;  %2366 = vmatprep.mubr.msk.f32.mxu1 %vm2582_vm0, %v2583_v3 }
 0x262   :  { %v1008_v56 = vmax.f32 %v971_v51, 0.0  ;;  %v931_v12 = vmul.f32 %v3270_v52, %v890_v40 }
 0x263   :  { %v2475_v32 = vpop.eup %2474  ;;  %v820_v5 = vadd.f32 1e-05, %v783_v18 }
 0x264   :  { %v725_v58 = vpop.xlane.xlu0 %724  ;;  %2367 = vmatmul.mubr.msk.f32.gmra.mrb[38].mxu1 %vm424_vm2, %v1008_v56  ;;  %v972_v14 = vadd.f32 %v3274_v2, %v931_v12  ;;  %v891_v39 = vmul.f32 %v2475_v32, %v3171_v22 }
 0x265   :  { %2480 = vrsqrt.f32 %v820_v5  ;;  %v784_v48 = vmul.f32 0.03125, %v725_v58  ;;  %2369 = vmatprep.mubr.msk.f32.mxu1 %vm2582_vm0, %v2583_v3 }
 0x266   :  { %v1009_v60 = vmax.f32 %v972_v14, 0.0  ;;  %v932_v57 = vmul.f32 %v3270_v52, %v891_v39 }
 0x267   :  { %v2477_v1 = vpop.eup %2476  ;;  %v821_v63 = vadd.f32 1e-05, %v784_v48 }
 0x268   :  { %2370 = vmatmul.mubr.msk.f32.gmra.mrb[40].mxu1 %vm424_vm2, %v1009_v60  ;;  %v728_v16 = vpop.xlane.xlu1 %727  ;;  %v973_v23 = vadd.f32 %v3274_v2, %v932_v57  ;;  %v892_v49 = vmul.f32 %v2477_v1, %v3177_v29 }
 0x269   :  { %2482 = vrsqrt.f32 %v821_v63  ;;  %v785_v8 = vmul.f32 0.03125, %v728_v16  ;;  %2372 = vmatprep.mubr.msk.f32.mxu1 %vm2582_vm0, %v2583_v3 }
 0x26a   :  { %v1010_v22 = vmax.f32 %v973_v23, 0.0  ;;  %v933_v11 = vmul.f32 %v3270_v52, %v892_v49 }
 0x26b   :  { %v2479_v13 = vpop.eup %2478  ;;  %v822_v59 = vadd.f32 1e-05, %v785_v8 }
 0x26c   :  { %v731_v6 = vpop.xlane.xlu0 %730  ;;  %2373 = vmatmul.mubr.msk.f32.gmra.mrb[42].mxu1 %vm424_vm2, %v1010_v22  ;;  %v974_v27 = vadd.f32 %v3274_v2, %v933_v11  ;;  %v893_v47 = vmul.f32 %v2479_v13, %v3183_v26 }
 0x26d   :  { %2484 = vrsqrt.f32 %v822_v59  ;;  %v786_v36 = vmul.f32 0.03125, %v731_v6  ;;  %2375 = vmatprep.mubr.msk.f32.mxu1 %vm2582_vm0, %v2583_v3 }
 0x26e   :  { %v1011_v29 = vmax.f32 %v974_v27, 0.0  ;;  %v934_v33 = vmul.f32 %v3270_v52, %v893_v47 }
 0x26f   :  { %v2481_v21 = vpop.eup %2480  ;;  %v823_v17 = vadd.f32 1e-05, %v786_v36 }
 0x270   :  { %2376 = vmatmul.mubr.msk.f32.gmra.mrb[44].mxu1 %vm424_vm2, %v1011_v29  ;;  %v734_v0 = vpop.xlane.xlu1 %733  ;;  %v975_v19 = vadd.f32 %v3274_v2, %v934_v33  ;;  %v894_v37 = vmul.f32 %v2481_v21, %v3189_v30 }
 0x271   :  { %2486 = vrsqrt.f32 %v823_v17  ;;  %v787_v10 = vmul.f32 0.03125, %v734_v0  ;;  %2378 = vmatprep.mubr.msk.f32.mxu1 %vm2582_vm0, %v2583_v3 }
 0x272   :  { %v1012_v26 = vmax.f32 %v975_v19, 0.0  ;;  %v935_v41 = vmul.f32 %v3270_v52, %v894_v37 }
 0x273   :  { %v2483_v45 = vpop.eup %2482  ;;  %v824_v62 = vadd.f32 1e-05, %v787_v10 }
 0x274   :  { %v737_v44 = vpop.xlane.xlu0 %736  ;;  %2379 = vmatmul.mubr.msk.f32.gmra.mrb[46].mxu1 %vm424_vm2, %v1012_v26  ;;  %v976_v46 = vadd.f32 %v3274_v2, %v935_v41  ;;  %v895_v7 = vmul.f32 %v2483_v45, %v3195_v34 }
 0x275   :  { %2488 = vrsqrt.f32 %v824_v62  ;;  %v788_v53 = vmul.f32 0.03125, %v737_v44  ;;  %2381 = vmatprep.mubr.msk.f32.mxu1 %vm2582_vm0, %v2583_v3 }
 0x276   :  { %v1013_v30 = vmax.f32 %v976_v46, 0.0  ;;  %v936_v24 = vmul.f32 %v3270_v52, %v895_v7 }
 0x277   :  { %v2485_v54 = vpop.eup %2484  ;;  %v825_v28 = vadd.f32 1e-05, %v788_v53 }
 0x278   :  { %2382 = vmatmul.mubr.msk.f32.gmra.mrb[48].mxu1 %vm424_vm2, %v1013_v30  ;;  %v740_v35 = vpop.xlane.xlu1 %739  ;;  %v977_v51 = vadd.f32 %v3274_v2, %v936_v24  ;;  %v896_v40 = vmul.f32 %v2485_v54, %v3201_v38 }
 0x279   :  { %2490 = vrsqrt.f32 %v825_v28  ;;  %v789_v18 = vmul.f32 0.03125, %v740_v35  ;;  %2384 = vmatprep.mubr.msk.f32.mxu1 %vm2582_vm0, %v2583_v3 }
 0x27a   :  { %v1014_v34 = vmax.f32 %v977_v51, 0.0  ;;  %v937_v56 = vmul.f32 %v3270_v52, %v896_v40 }
 0x27b   :  { %v2487_v12 = vpop.eup %2486  ;;  %v826_v32 = vadd.f32 1e-05, %v789_v18 }
 0x27c   :  { %v743_v5 = vpop.xlane.xlu0 %742  ;;  %2385 = vmatmul.mubr.msk.f32.gmra.mrb[50].mxu1 %vm424_vm2, %v1014_v34  ;;  %v978_v58 = vadd.f32 %v3274_v2, %v937_v56  ;;  %v897_v14 = vmul.f32 %v2487_v12, %v3207_v42 }
 0x27d   :  { %2492 = vrsqrt.f32 %v826_v32  ;;  %v790_v39 = vmul.f32 0.03125, %v743_v5  ;;  %2387 = vmatprep.mubr.msk.f32.mxu1 %vm2582_vm0, %v2583_v3 }
 0x27e   :  { %v1015_v38 = vmax.f32 %v978_v58, 0.0  ;;  %v938_v48 = vmul.f32 %v3270_v52, %v897_v14 }
 0x27f   :  { %v2489_v60 = vpop.eup %2488  ;;  %v827_v57 = vadd.f32 1e-05, %v790_v39 }
 0x280   :  { %2388 = vmatmul.mubr.msk.f32.gmra.mrb[52].mxu1 %vm424_vm2, %v1015_v38  ;;  %v746_v1 = vpop.xlane.xlu1 %745  ;;  %v979_v63 = vadd.f32 %v3274_v2, %v938_v48  ;;  %v898_v16 = vmul.f32 %v2489_v60, %v3213_v50 }
 0x281   :  { %2494 = vrsqrt.f32 %v827_v57  ;;  %v791_v23 = vmul.f32 0.03125, %v746_v1  ;;  %2390 = vmatprep.mubr.msk.f32.mxu1 %vm2582_vm0, %v2583_v3 }
 0x282   :  { %v1016_v42 = vmax.f32 %v979_v63, 0.0  ;;  %v939_v49 = vmul.f32 %v3270_v52, %v898_v16  ;;  %v1028_v16 = vsub.s32 3, %v2836_v43 }
 0x283   :  { %v2491_v8 = vpop.eup %2490  ;;  %v828_v22 = vadd.f32 1e-05, %v791_v23 }
 0x284   :  { %v749_v11 = vpop.xlane.xlu0 %748  ;;  %2391 = vmatmul.mubr.msk.f32.gmra.mrb[54].mxu1 %vm424_vm2, %v1016_v42  ;;  %v980_v13 = vadd.f32 %v3274_v2, %v939_v49  ;;  %v899_v59 = vmul.f32 %v2491_v8, %v3219_v55 }
 0x285   :  { %2496 = vrsqrt.f32 %v828_v22  ;;  %v792_v6 = vmul.f32 0.03125, %v749_v11  ;;  %2393 = vmatprep.mubr.msk.f32.mxu1 %vm2582_vm0, %v2583_v3 }
 0x286   :  { %v1017_v50 = vmax.f32 %v980_v13, 0.0  ;;  %v940_v27 = vmul.f32 %v3270_v52, %v899_v59 }
 0x287   :  { %v2493_v47 = vpop.eup %2492  ;;  %v829_v36 = vadd.f32 1e-05, %v792_v6 }
 0x288   :  { %2394 = vmatmul.mubr.msk.f32.gmra.mrb[56].mxu1 %vm424_vm2, %v1017_v50  ;;  %v752_v29 = vpop.xlane.xlu1 %751  ;;  %v981_v33 = vadd.f32 %v3274_v2, %v940_v27  ;;  %v900_v21 = vmul.f32 %v2493_v47, %v3225_v61 }
 0x289   :  { %2498 = vrsqrt.f32 %v829_v36  ;;  %v793_v17 = vmul.f32 0.03125, %v752_v29  ;;  %2396 = vmatprep.mubr.msk.f32.mxu1 %vm2582_vm0, %v2583_v3 }
 0x28a   :  { %v1018_v55 = vmax.f32 %v981_v33, 0.0  ;;  %v941_v0 = vmul.f32 %v3270_v52, %v900_v21 }
 0x28b   :  { %v2495_v19 = vpop.eup %2494  ;;  %v830_v37 = vadd.f32 1e-05, %v793_v17 }
 0x28c   :  { %v755_v10 = vpop.xlane.xlu0 %754  ;;  %2397 = vmatmul.mubr.msk.f32.gmra.mrb[58].mxu1 %vm424_vm2, %v1018_v55  ;;  %v982_v26 = vadd.f32 %v3274_v2, %v941_v0  ;;  %v901_v41 = vmul.f32 %v2495_v19, %v3231_v4 }
 0x28d   :  { %2500 = vrsqrt.f32 %v830_v37  ;;  %v794_v45 = vmul.f32 0.03125, %v755_v10  ;;  %2399 = vmatprep.mubr.msk.f32.mxu1 %vm2582_vm0, %v2583_v3 }
 0x28e   :  { %v1019_v61 = vmax.f32 %v982_v26, 0.0  ;;  %v942_v62 = vmul.f32 %v3270_v52, %v901_v41 }
 0x28f   :  { %v2497_v44 = vpop.eup %2496  ;;  %v831_v46 = vadd.f32 1e-05, %v794_v45 }
 0x290   :  { %2400 = vmatmul.mubr.msk.f32.gmra.mrb[60].mxu1 %vm424_vm2, %v1019_v61  ;;  %v758_v7 = vpop.xlane.xlu1 %757  ;;  %v983_v53 = vadd.f32 %v3274_v2, %v942_v62  ;;  %v902_v30 = vmul.f32 %v2497_v44, %v3237_v9 }
 0x291   :  { %2502 = vrsqrt.f32 %v831_v46  ;;  %v795_v24 = vmul.f32 0.03125, %v758_v7  ;;  %2402 = vmatprep.mubr.msk.f32.mxu1 %vm2582_vm0, %v2583_v3 }
 0x292   :  { %v1020_v4 = vmax.f32 %v983_v53, 0.0  ;;  %v943_v54 = vmul.f32 %v3270_v52, %v902_v30 }
 0x293   :  { %v2499_v28 = vpop.eup %2498  ;;  %v832_v35 = vadd.f32 1e-05, %v795_v24 }
 0x294   :  { %2403 = vmatmul.mubr.msk.f32.gmra.mrb[62].mxu1 %vm424_vm2, %v1020_v4  ;;  %v984_v51 = vadd.f32 %v3274_v2, %v943_v54  ;;  %v903_v40 = vmul.f32 %v2499_v28, %v3243_v15 }
 0x295   :  { %2504 = vrsqrt.f32 %v832_v35  ;;  %2405 = vmatprep.mubr.msk.f32.mxu1 %vm2582_vm0, %v2583_v3 }
 0x296   :  { %v1021_v9 = vmax.f32 %v984_v51, 0.0  ;;  %v944_v18 = vmul.f32 %v3270_v52, %v903_v40 }
 0x297   :  { %v2501_v34 = vpop.eup %2500 }
 0x298   :  { %2406 = vmatmul.mubr.msk.f32.gmra.mrb[64].mxu1 %vm424_vm2, %v1021_v9  ;;  %v985_v56 = vadd.f32 %v3274_v2, %v944_v18  ;;  %v904_v12 = vmul.f32 %v2501_v34, %v3249_v20 }
 0x299   :  { %2408 = vmatprep.mubr.msk.f32.mxu1 %vm2582_vm0, %v2583_v3 }
 0x29a   :  { %v1022_v32 = vmax.f32 %v985_v56, 0.0  ;;  %v945_v15 = vmul.f32 %v3270_v52, %v904_v12 }
 0x29b   :  { %v2503_v5 = vpop.eup %2502 }
 0x29c   :  { %2409 = vmatmul.mubr.msk.f32.gmra.mrb[66].mxu1 %vm424_vm2, %v1022_v32  ;;  %v986_v58 = vadd.f32 %v3274_v2, %v945_v15  ;;  %v905_v14 = vmul.f32 %v2503_v5, %v3255_v25 }
 0x29d   :  { %2411 = vmatprep.mubr.msk.f32.mxu1 %vm2582_vm0, %v2583_v3 }
 0x29e   :  { %v1023_v39 = vmax.f32 %v986_v58, 0.0  ;;  %v946_v38 = vmul.f32 %v3270_v52, %v905_v14 }
 0x29f   :  { %v2505_v20 = vpop.eup %2504 }
 0x2a0   :  { %2412 = vmatmul.mubr.msk.f32.gmra.mrb[68].mxu1 %vm424_vm2, %v1023_v39  ;;  %v987_v48 = vadd.f32 %v3274_v2, %v946_v38  ;;  %v906_v60 = vmul.f32 %v2505_v20, %v3261_v31  ;;  %v3499_v31 = vld [vmem:[%s4180_s2] sm:$0x3f] }
 0x2a1   :  { %2414 = vmatprep.mubr.msk.f32.mxu1 %vm2582_vm0, %v2583_v3  ;;  %v3502_v23 = vrot.slane %v3499_v31, %v1028_v16 }
 0x2a2   :  { %v1024_v57 = vmax.f32 %v987_v48, 0.0  ;;  %v947_v1 = vmul.f32 %v3270_v52, %v906_v60 }
 0x2a4   :  { %2415 = vmatmul.mubr.msk.f32.gmra.mrb[70].mxu1 %vm424_vm2, %v1024_v57  ;;  %v988_v25 = vadd.f32 %v3274_v2, %v947_v1 }
 0x2a5   :  { %2417 = vmatprep.mubr.msk.f32.mxu1 %vm2582_vm0, %v2583_v3 }
 0x2a6   :  { %v1025_v63 = vmax.f32 %v988_v25, 0.0 }
 0x2a8   :  { %2418 = vmatmul.mubr.msk.f32.gmra.mrb[72].mxu1 %vm424_vm2, %v1025_v63 }
 0x2eb   :  { %v1207_v52 = vpop.f32.mrb[0].mxu1 }
 0x2ec   :  { %v3505_v42 = vadd.f32 %v1207_v52, %v3502_v23  ;;  %v2311_v2 = vpop.f32.mrb[1].mxu1 }
 0x2ee   :  { %v1391_v3 = vsel %vm424_vm2, %v3505_v42, 0.0 }
 0x2ef   :  { %v1212_v49 = vpop.f32.mrb[2].mxu1  ;;  %1392 = vadd.xlane.f32.xlu0 %v1391_v3 }
 0x2f0   :  { %v3510_v8 = vadd.f32 %v1212_v49, %v3502_v23  ;;  %v2314_v22 = vpop.f32.mrb[3].mxu1 }
 0x2f2   :  { %v1394_v11 = vsel %vm424_vm2, %v3510_v8, 0.0 }
 0x2f3   :  { %v1217_v13 = vpop.f32.mrb[4].mxu1  ;;  %1395 = vadd.xlane.f32.xlu1 %v1394_v11 }
 0x2f4   :  { %v3515_v59 = vadd.f32 %v1217_v13, %v3502_v23  ;;  %v2317_v6 = vpop.f32.mrb[5].mxu1 }
 0x2f6   :  { %v1397_v50 = vsel %vm424_vm2, %v3515_v59, 0.0 }
 0x2f7   :  { %v1222_v27 = vpop.f32.mrb[6].mxu1  ;;  %1398 = vadd.xlane.f32.xlu0 %v1397_v50 }
 0x2f8   :  { %v3520_v47 = vadd.f32 %v1222_v27, %v3502_v23  ;;  %v2320_v36 = vpop.f32.mrb[7].mxu1 }
 0x2fa   :  { %v1400_v29 = vsel %vm424_vm2, %v3520_v47, 0.0 }
 0x2fb   :  { %v1227_v33 = vpop.f32.mrb[8].mxu1  ;;  %1401 = vadd.xlane.f32.xlu1 %v1400_v29 }
 0x2fc   :  { %v3525_v21 = vadd.f32 %v1227_v33, %v3502_v23  ;;  %v2323_v17 = vpop.f32.mrb[9].mxu1 }
 0x2fe   :  { %v1403_v55 = vsel %vm424_vm2, %v3525_v21, 0.0 }
 0x2ff   :  { %v1232_v0 = vpop.f32.mrb[10].mxu1  ;;  %1404 = vadd.xlane.f32.xlu0 %v1403_v55 }
 0x300   :  { %v3530_v19 = vadd.f32 %v1232_v0, %v3502_v23  ;;  %v2326_v37 = vpop.f32.mrb[11].mxu1 }
 0x302   :  { %v1406_v10 = vsel %vm424_vm2, %v3530_v19, 0.0 }
 0x303   :  { %v1237_v26 = vpop.f32.mrb[12].mxu1  ;;  %1407 = vadd.xlane.f32.xlu1 %v1406_v10 }
 0x304   :  { %v3535_v41 = vadd.f32 %v1237_v26, %v3502_v23  ;;  %v2329_v45 = vpop.f32.mrb[13].mxu1 }
 0x306   :  { %v1409_v61 = vsel %vm424_vm2, %v3535_v41, 0.0 }
 0x307   :  { %v1242_v62 = vpop.f32.mrb[14].mxu1  ;;  %1410 = vadd.xlane.f32.xlu0 %v1409_v61 }
 0x308   :  { %v3540_v44 = vadd.f32 %v1242_v62, %v3502_v23  ;;  %v2332_v46 = vpop.f32.mrb[15].mxu1 }
 0x30a   :  { %v1412_v7 = vsel %vm424_vm2, %v3540_v44, 0.0 }
 0x30b   :  { %v1247_v53 = vpop.f32.mrb[16].mxu1  ;;  %1413 = vadd.xlane.f32.xlu1 %v1412_v7 }
 0x30c   :  { %v3545_v30 = vadd.f32 %v1247_v53, %v3502_v23  ;;  %v2335_v24 = vpop.f32.mrb[17].mxu1 }
 0x30e   :  { %v1415_v4 = vsel %vm424_vm2, %v3545_v30, 0.0 }
 0x30f   :  { %v1252_v54 = vpop.f32.mrb[18].mxu1  ;;  %1416 = vadd.xlane.f32.xlu0 %v1415_v4 }
 0x310   :  { %v3550_v28 = vadd.f32 %v1252_v54, %v3502_v23  ;;  %v2338_v35 = vpop.f32.mrb[19].mxu1 }
 0x312   :  { %v1418_v51 = vsel %vm424_vm2, %v3550_v28, 0.0 }
 0x313   :  { %v1257_v40 = vpop.f32.mrb[20].mxu1  ;;  %1419 = vadd.xlane.f32.xlu1 %v1418_v51 }
 0x314   :  { %v3555_v9 = vadd.f32 %v1257_v40, %v3502_v23  ;;  %v2341_v18 = vpop.f32.mrb[21].mxu1 }
 0x316   :  { %v1421_v34 = vsel %vm424_vm2, %v3555_v9, 0.0 }
 0x317   :  { %v1262_v56 = vpop.f32.mrb[22].mxu1  ;;  %1422 = vadd.xlane.f32.xlu0 %v1421_v34 }
 0x318   :  { %v3560_v12 = vadd.f32 %v1262_v56, %v3502_v23  ;;  %v2344_v32 = vpop.f32.mrb[23].mxu1 }
 0x31a   :  { %v1424_v15 = vsel %vm424_vm2, %v3560_v12, 0.0 }
 0x31b   :  { %v1267_v5 = vpop.f32.mrb[24].mxu1  ;;  %1425 = vadd.xlane.f32.xlu1 %v1424_v15 }
 0x31c   :  { %v3565_v58 = vadd.f32 %v1267_v5, %v3502_v23  ;;  %v2347_v14 = vpop.f32.mrb[25].mxu1 }
 0x31e   :  { %v1427_v39 = vsel %vm424_vm2, %v3565_v58, 0.0 }
 0x31f   :  { %v1272_v38 = vpop.f32.mrb[26].mxu1  ;;  %1428 = vadd.xlane.f32.xlu0 %v1427_v39 }
 0x320   :  { %v3570_v20 = vadd.f32 %v1272_v38, %v3502_v23  ;;  %v2350_v48 = vpop.f32.mrb[27].mxu1 }
 0x322   :  { %v1430_v60 = vsel %vm424_vm2, %v3570_v20, 0.0 }
 0x323   :  { %v1277_v57 = vpop.f32.mrb[28].mxu1  ;;  %1431 = vadd.xlane.f32.xlu1 %v1430_v60 }
 0x324   :  { %v3575_v1 = vadd.f32 %v1277_v57, %v3502_v23  ;;  %v2353_v25 = vpop.f32.mrb[29].mxu1 }
 0x326   :  { %v1433_v63 = vsel %vm424_vm2, %v3575_v1, 0.0 }
 0x327   :  { %v1282_v16 = vpop.f32.mrb[30].mxu1  ;;  %1434 = vadd.xlane.f32.xlu0 %v1433_v63 }
 0x328   :  { %v3580_v52 = vadd.f32 %v1282_v16, %v3502_v23  ;;  %v2356_v2 = vpop.f32.mrb[31].mxu1 }
 0x32a   :  { %v1436_v3 = vsel %vm424_vm2, %v3580_v52, 0.0 }
 0x32b   :  { %v1287_v49 = vpop.f32.mrb[32].mxu1  ;;  %1437 = vadd.xlane.f32.xlu1 %v1436_v3 }
 0x32c   :  { %v3585_v22 = vadd.f32 %v1287_v49, %v3502_v23  ;;  %v2359_v11 = vpop.f32.mrb[33].mxu1 }
 0x32e   :  { %v1439_v13 = vsel %vm424_vm2, %v3585_v22, 0.0 }
 0x32f   :  { %v1292_v6 = vpop.f32.mrb[34].mxu1  ;;  %1440 = vadd.xlane.f32.xlu0 %v1439_v13 }
 0x330   :  { %v3590_v50 = vadd.f32 %v1292_v6, %v3502_v23  ;;  %v2362_v27 = vpop.f32.mrb[35].mxu1 }
 0x332   :  { %v1442_v36 = vsel %vm424_vm2, %v3590_v50, 0.0 }
 0x333   :  { %1443 = vadd.xlane.f32.xlu1 %v1442_v36  ;;  %v1297_v29 = vpop.f32.mrb[36].mxu1 }
 0x334   :  { %v3595_v33 = vadd.f32 %v1297_v29, %v3502_v23  ;;  %v2365_v17 = vpop.f32.mrb[37].mxu1 }
 0x336   :  { %v1445_v55 = vsel %vm424_vm2, %v3595_v33, 0.0 }
 0x337   :  { %1446 = vadd.xlane.f32.xlu0 %v1445_v55  ;;  %v1302_v0 = vpop.f32.mrb[38].mxu1 }
 0x338   :  { %v3600_v37 = vadd.f32 %v1302_v0, %v3502_v23  ;;  %v2368_v10 = vpop.f32.mrb[39].mxu1 }
 0x33a   :  { %v1448_v26 = vsel %vm424_vm2, %v3600_v37, 0.0 }
 0x33b   :  { %1449 = vadd.xlane.f32.xlu1 %v1448_v26  ;;  %v1307_v45 = vpop.f32.mrb[40].mxu1 }
 0x33c   :  { %v3605_v61 = vadd.f32 %v1307_v45, %v3502_v23  ;;  %v2371_v62 = vpop.f32.mrb[41].mxu1 }
 0x33e   :  { %v1451_v46 = vsel %vm424_vm2, %v3605_v61, 0.0 }
 0x33f   :  { %1452 = vadd.xlane.f32.xlu0 %v1451_v46  ;;  %v1312_v7 = vpop.f32.mrb[42].mxu1 }
 0x340   :  { %v3610_v53 = vadd.f32 %v1312_v7, %v3502_v23  ;;  %v2374_v24 = vpop.f32.mrb[43].mxu1 }
 0x342   :  { %v1454_v4 = vsel %vm424_vm2, %v3610_v53, 0.0 }
 0x343   :  { %1455 = vadd.xlane.f32.xlu1 %v1454_v4  ;;  %v1317_v54 = vpop.f32.mrb[44].mxu1 }
 0x344   :  { %v3615_v35 = vadd.f32 %v1317_v54, %v3502_v23  ;;  %v2377_v51 = vpop.f32.mrb[45].mxu1 }
 0x346   :  { %v1457_v40 = vsel %vm424_vm2, %v3615_v35, 0.0 }
 0x347   :  { %1458 = vadd.xlane.f32.xlu0 %v1457_v40  ;;  %v1322_v18 = vpop.f32.mrb[46].mxu1 }
 0x348   :  { %v3620_v34 = vadd.f32 %v1322_v18, %v3502_v23  ;;  %v2380_v56 = vpop.f32.mrb[47].mxu1 }
 0x34a   :  { %v1460_v32 = vsel %vm424_vm2, %v3620_v34, 0.0 }
 0x34b   :  { %1461 = vadd.xlane.f32.xlu1 %v1460_v32  ;;  %v1327_v15 = vpop.f32.mrb[48].mxu1 }
 0x34c   :  { %v3625_v5 = vadd.f32 %v1327_v15, %v3502_v23  ;;  %v2383_v14 = vpop.f32.mrb[49].mxu1 }
 0x34e   :  { %v1463_v39 = vsel %vm424_vm2, %v3625_v5, 0.0 }
 0x34f   :  { %1464 = vadd.xlane.f32.xlu0 %v1463_v39  ;;  %v1332_v38 = vpop.f32.mrb[50].mxu1 }
 0x350   :  { %v3630_v48 = vadd.f32 %v1332_v38, %v3502_v23  ;;  %v2386_v60 = vpop.f32.mrb[51].mxu1 }
 0x352   :  { %v1466_v57 = vsel %vm424_vm2, %v3630_v48, 0.0 }
 0x353   :  { %1467 = vadd.xlane.f32.xlu1 %v1466_v57  ;;  %v1337_v25 = vpop.f32.mrb[52].mxu1 }
 0x354   :  { %v3635_v63 = vadd.f32 %v1337_v25, %v3502_v23  ;;  %v2389_v16 = vpop.f32.mrb[53].mxu1 }
 0x356   :  { %v1469_v2 = vsel %vm424_vm2, %v3635_v63, 0.0 }
 0x357   :  { %1470 = vadd.xlane.f32.xlu0 %v1469_v2  ;;  %v1342_v3 = vpop.f32.mrb[54].mxu1 }
 0x358   :  { %v3640_v49 = vadd.f32 %v1342_v3, %v3502_v23  ;;  %v2392_v11 = vpop.f32.mrb[55].mxu1 }
 0x35a   :  { %v1472_v13 = vsel %vm424_vm2, %v3640_v49, 0.0 }
 0x35b   :  { %1473 = vadd.xlane.f32.xlu1 %v1472_v13  ;;  %v1347_v6 = vpop.f32.mrb[56].mxu1 }
 0x35c   :  { %v3645_v27 = vadd.f32 %v1347_v6, %v3502_v23  ;;  %v2395_v36 = vpop.f32.mrb[57].mxu1 }
 0x35e   :  { %v1475_v29 = vsel %vm424_vm2, %v3645_v27, 0.0 }
 0x35f   :  { %1476 = vadd.xlane.f32.xlu0 %v1475_v29  ;;  %v1352_v17 = vpop.f32.mrb[58].mxu1 }
 0x360   :  { %v3650_v55 = vadd.f32 %v1352_v17, %v3502_v23  ;;  %v2398_v0 = vpop.f32.mrb[59].mxu1 }
 0x362   :  { %v1478_v10 = vsel %vm424_vm2, %v3650_v55, 0.0 }
 0x363   :  { %1479 = vadd.xlane.f32.xlu1 %v1478_v10  ;;  %v1357_v26 = vpop.f32.mrb[60].mxu1 }
 0x364   :  { %v3655_v45 = vadd.f32 %v1357_v26, %v3502_v23  ;;  %v2401_v62 = vpop.f32.mrb[61].mxu1 }
 0x366   :  { %v1481_v46 = vsel %vm424_vm2, %v3655_v45, 0.0 }
 0x367   :  { %1482 = vadd.xlane.f32.xlu0 %v1481_v46  ;;  %v1362_v7 = vpop.f32.mrb[62].mxu1 }
 0x368   :  { %v3660_v24 = vadd.f32 %v1362_v7, %v3502_v23  ;;  %v2404_v4 = vpop.f32.mrb[63].mxu1 }
 0x36a   :  { %v1484_v54 = vsel %vm424_vm2, %v3660_v24, 0.0 }
 0x36b   :  { %1485 = vadd.xlane.f32.xlu1 %v1484_v54  ;;  %v1367_v51 = vpop.f32.mrb[64].mxu1 }
 0x36c   :  { %v3665_v40 = vadd.f32 %v1367_v51, %v3502_v23  ;;  %v2407_v18 = vpop.f32.mrb[65].mxu1 }
 0x36e   :  { %v1487_v56 = vsel %vm424_vm2, %v3665_v40, 0.0 }
 0x36f   :  { %1488 = vadd.xlane.f32.xlu0 %v1487_v56  ;;  %v1372_v32 = vpop.f32.mrb[66].mxu1 }
 0x370   :  { %v3670_v15 = vadd.f32 %v1372_v32, %v3502_v23  ;;  %v2410_v14 = vpop.f32.mrb[67].mxu1 }
 0x372   :  { %v1490_v39 = vsel %vm424_vm2, %v3670_v15, 0.0 }
 0x373   :  { %1491 = vadd.xlane.f32.xlu1 %v1490_v39  ;;  %v1377_v38 = vpop.f32.mrb[68].mxu1 }
 0x374   :  { %v3675_v60 = vadd.f32 %v1377_v38, %v3502_v23  ;;  %v2413_v57 = vpop.f32.mrb[69].mxu1 }
 0x376   :  { %v1493_v25 = vsel %vm424_vm2, %v3675_v60, 0.0 }
 0x377   :  { %1494 = vadd.xlane.f32.xlu0 %v1493_v25  ;;  %v1382_v16 = vpop.f32.mrb[70].mxu1 }
 0x378   :  { %v3680_v2 = vadd.f32 %v1382_v16, %v3502_v23  ;;  %v2416_v3 = vpop.f32.mrb[71].mxu1 }
 0x37a   :  { %v1496_v11 = vsel %vm424_vm2, %v3680_v2, 0.0 }
 0x37b   :  { %1497 = vadd.xlane.f32.xlu1 %v1496_v11  ;;  %v1387_v13 = vpop.f32.mrb[72].mxu1 }
 0x37c   :  { %v3685_v6 = vadd.f32 %v1387_v13, %v3502_v23  ;;  %v1393_v36 = vpop.xlane.xlu0 %1392  ;;  %v2419_v29 = vpop.f32.mrb[73].mxu1 }
 0x37d   :  { %v1502_v17 = vmul.f32 0.03125, %v1393_v36 }
 0x37e   :  { %v1499_v0 = vsel %vm424_vm2, %v3685_v6, 0.0 }
 0x37f   :  { %v3690_v10 = vsub.f32 %v3505_v42, %v1502_v17  ;;  %1500 = vadd.xlane.f32.xlu0 %v1499_v0 }
 0x380   :  { %v1396_v26 = vpop.xlane.xlu1 %1395 }
 0x381   :  { %v1503_v62 = vmul.f32 0.03125, %v1396_v26  ;;  %v1576_v46 = vmul.f32 %v3690_v10, %v3690_v10 }
 0x383   :  { %v3695_v7 = vsub.f32 %v3510_v8, %v1503_v62  ;;  %v1613_v23 = vsel %vm424_vm2, %v1576_v46, 0.0 }
 0x384   :  { %v1399_v4 = vpop.xlane.xlu0 %1398  ;;  %1614 = vadd.xlane.f32.xlu1 %v1613_v23 }
 0x385   :  { %v1504_v54 = vmul.f32 0.03125, %v1399_v4  ;;  %v1577_v51 = vmul.f32 %v3695_v7, %v3695_v7 }
 0x387   :  { %v3701_v42 = vsub.f32 %v3515_v59, %v1504_v54  ;;  %v1616_v18 = vsel %vm424_vm2, %v1577_v51, 0.0 }
 0x388   :  { %1617 = vadd.xlane.f32.xlu0 %v1616_v18  ;;  %v1402_v56 = vpop.xlane.xlu1 %1401 }
 0x389   :  { %v1505_v32 = vmul.f32 0.03125, %v1402_v56  ;;  %v1578_v8 = vmul.f32 %v3701_v42, %v3701_v42 }
 0x38b   :  { %v3707_v14 = vsub.f32 %v3520_v47, %v1505_v32  ;;  %v1619_v39 = vsel %vm424_vm2, %v1578_v8, 0.0 }
 0x38c   :  { %v1405_v38 = vpop.xlane.xlu0 %1404  ;;  %1620 = vadd.xlane.f32.xlu1 %v1619_v39 }
 0x38d   :  { %v1506_v57 = vmul.f32 0.03125, %v1405_v38  ;;  %v1579_v59 = vmul.f32 %v3707_v14, %v3707_v14 }
 0x38f   :  { %v3713_v25 = vsub.f32 %v3525_v21, %v1506_v57  ;;  %v1622_v16 = vsel %vm424_vm2, %v1579_v59, 0.0 }
 0x390   :  { %1623 = vadd.xlane.f32.xlu0 %v1622_v16  ;;  %v1408_v3 = vpop.xlane.xlu1 %1407 }
 0x391   :  { %v1507_v11 = vmul.f32 0.03125, %v1408_v3  ;;  %v1580_v47 = vmul.f32 %v3713_v25, %v3713_v25 }
 0x393   :  { %v3719_v13 = vsub.f32 %v3530_v19, %v1507_v11  ;;  %v1625_v36 = vsel %vm424_vm2, %v1580_v47, 0.0 }
 0x394   :  { %v1411_v29 = vpop.xlane.xlu0 %1410  ;;  %1626 = vadd.xlane.f32.xlu1 %v1625_v36 }
 0x395   :  { %v1508_v17 = vmul.f32 0.03125, %v1411_v29  ;;  %v1581_v21 = vmul.f32 %v3719_v13, %v3719_v13 }
 0x397   :  { %v3725_v0 = vsub.f32 %v3535_v41, %v1508_v17  ;;  %v1628_v26 = vsel %vm424_vm2, %v1581_v21, 0.0 }
 0x398   :  { %1629 = vadd.xlane.f32.xlu0 %v1628_v26  ;;  %v1414_v62 = vpop.xlane.xlu1 %1413 }
 0x399   :  { %v1509_v46 = vmul.f32 0.03125, %v1414_v62  ;;  %v1582_v19 = vmul.f32 %v3725_v0, %v3725_v0 }
 0x39b   :  { %v3731_v23 = vsub.f32 %v3540_v44, %v1509_v46  ;;  %v1631_v4 = vsel %vm424_vm2, %v1582_v19, 0.0 }
 0x39c   :  { %v1417_v54 = vpop.xlane.xlu0 %1416  ;;  %1632 = vadd.xlane.f32.xlu1 %v1631_v4 }
 0x39d   :  { %v1510_v51 = vmul.f32 0.03125, %v1417_v54  ;;  %v1583_v41 = vmul.f32 %v3731_v23, %v3731_v23 }
 0x39f   :  { %v3737_v18 = vsub.f32 %v3545_v30, %v1510_v51  ;;  %v1634_v56 = vsel %vm424_vm2, %v1583_v41, 0.0 }
 0x3a0   :  { %1635 = vadd.xlane.f32.xlu0 %v1634_v56  ;;  %v1420_v32 = vpop.xlane.xlu1 %1419 }
 0x3a1   :  { %v1511_v8 = vmul.f32 0.03125, %v1420_v32  ;;  %v1584_v44 = vmul.f32 %v3737_v18, %v3737_v18 }
 0x3a3   :  { %v3743_v39 = vsub.f32 %v3550_v28, %v1511_v8  ;;  %v1637_v38 = vsel %vm424_vm2, %v1584_v44, 0.0 }
 0x3a4   :  { %v1423_v57 = vpop.xlane.xlu0 %1422  ;;  %1638 = vadd.xlane.f32.xlu1 %v1637_v38 }
 0x3a5   :  { %v1512_v59 = vmul.f32 0.03125, %v1423_v57  ;;  %v1585_v30 = vmul.f32 %v3743_v39, %v3743_v39 }
 0x3a7   :  { %v3749_v16 = vsub.f32 %v3555_v9, %v1512_v59  ;;  %v1640_v3 = vsel %vm424_vm2, %v1585_v30, 0.0 }
 0x3a8   :  { %1641 = vadd.xlane.f32.xlu0 %v1640_v3  ;;  %v1426_v11 = vpop.xlane.xlu1 %1425 }
 0x3a9   :  { %v1513_v47 = vmul.f32 0.03125, %v1426_v11  ;;  %v1586_v28 = vmul.f32 %v3749_v16, %v3749_v16 }
 0x3ab   :  { %v3755_v36 = vsub.f32 %v3560_v12, %v1513_v47  ;;  %v1643_v29 = vsel %vm424_vm2, %v1586_v28, 0.0 }
 0x3ac   :  { %v1429_v17 = vpop.xlane.xlu0 %1428  ;;  %1644 = vadd.xlane.f32.xlu1 %v1643_v29 }
 0x3ad   :  { %v1514_v21 = vmul.f32 0.03125, %v1429_v17  ;;  %v1587_v9 = vmul.f32 %v3755_v36, %v3755_v36 }
 0x3af   :  { %v3761_v26 = vsub.f32 %v3565_v58, %v1514_v21  ;;  %v1646_v62 = vsel %vm424_vm2, %v1587_v9, 0.0 }
 0x3b0   :  { %1647 = vadd.xlane.f32.xlu0 %v1646_v62  ;;  %v1432_v46 = vpop.xlane.xlu1 %1431 }
 0x3b1   :  { %v1515_v19 = vmul.f32 0.03125, %v1432_v46  ;;  %v1588_v12 = vmul.f32 %v3761_v26, %v3761_v26 }
 0x3b3   :  { %v3767_v4 = vsub.f32 %v3570_v20, %v1515_v19  ;;  %v1649_v54 = vsel %vm424_vm2, %v1588_v12, 0.0 }
 0x3b4   :  { %v1435_v51 = vpop.xlane.xlu0 %1434  ;;  %1650 = vadd.xlane.f32.xlu1 %v1649_v54 }
 0x3b5   :  { %v1516_v41 = vmul.f32 0.03125, %v1435_v51  ;;  %v1589_v58 = vmul.f32 %v3767_v4, %v3767_v4 }
 0x3b7   :  { %v3773_v56 = vsub.f32 %v3575_v1, %v1516_v41  ;;  %v1652_v32 = vsel %vm424_vm2, %v1589_v58, 0.0 }
 0x3b8   :  { %1653 = vadd.xlane.f32.xlu0 %v1652_v32  ;;  %v1438_v8 = vpop.xlane.xlu1 %1437 }
 0x3b9   :  { %v1517_v44 = vmul.f32 0.03125, %v1438_v8  ;;  %v1590_v20 = vmul.f32 %v3773_v56, %v3773_v56 }
 0x3bb   :  { %v3779_v38 = vsub.f32 %v3580_v52, %v1517_v44  ;;  %v1655_v57 = vsel %vm424_vm2, %v1590_v20, 0.0 }
 0x3bc   :  { %v1441_v59 = vpop.xlane.xlu0 %1440  ;;  %1656 = vadd.xlane.f32.xlu1 %v1655_v57 }
 0x3bd   :  { %v1518_v30 = vmul.f32 0.03125, %v1441_v59  ;;  %v1591_v1 = vmul.f32 %v3779_v38, %v3779_v38 }
 0x3bf   :  { %v3785_v3 = vsub.f32 %v3585_v22, %v1518_v30  ;;  %v1658_v11 = vsel %vm424_vm2, %v1591_v1, 0.0 }
 0x3c0   :  { %1659 = vadd.xlane.f32.xlu0 %v1658_v11  ;;  %v1444_v47 = vpop.xlane.xlu1 %1443 }
 0x3c1   :  { %v1519_v28 = vmul.f32 0.03125, %v1444_v47  ;;  %v1592_v52 = vmul.f32 %v3785_v3, %v3785_v3 }
 0x3c3   :  { %v3791_v29 = vsub.f32 %v3590_v50, %v1519_v28  ;;  %v1661_v17 = vsel %vm424_vm2, %v1592_v52, 0.0 }
 0x3c4   :  { %v1447_v21 = vpop.xlane.xlu0 %1446  ;;  %1662 = vadd.xlane.f32.xlu1 %v1661_v17 }
 0x3c5   :  { %v1520_v9 = vmul.f32 0.03125, %v1447_v21  ;;  %v1593_v22 = vmul.f32 %v3791_v29, %v3791_v29 }
 0x3c7   :  { %v3797_v62 = vsub.f32 %v3595_v33, %v1520_v9  ;;  %v1664_v46 = vsel %vm424_vm2, %v1593_v22, 0.0 }
 0x3c8   :  { %1665 = vadd.xlane.f32.xlu0 %v1664_v46  ;;  %v1450_v19 = vpop.xlane.xlu1 %1449 }
 0x3c9   :  { %v1521_v12 = vmul.f32 0.03125, %v1450_v19  ;;  %v1594_v50 = vmul.f32 %v3797_v62, %v3797_v62 }
 0x3cb   :  { %v3803_v54 = vsub.f32 %v3600_v37, %v1521_v12  ;;  %v1667_v51 = vsel %vm424_vm2, %v1594_v50, 0.0 }
 0x3cc   :  { %v1453_v41 = vpop.xlane.xlu0 %1452  ;;  %1668 = vadd.xlane.f32.xlu1 %v1667_v51 }
 0x3cd   :  { %v1522_v58 = vmul.f32 0.03125, %v1453_v41  ;;  %v1595_v33 = vmul.f32 %v3803_v54, %v3803_v54 }
 0x3cf   :  { %v3809_v32 = vsub.f32 %v3605_v61, %v1522_v58  ;;  %v1670_v8 = vsel %vm424_vm2, %v1595_v33, 0.0 }
 0x3d0   :  { %1671 = vadd.xlane.f32.xlu0 %v1670_v8  ;;  %v1456_v44 = vpop.xlane.xlu1 %1455 }
 0x3d1   :  { %v1523_v20 = vmul.f32 0.03125, %v1456_v44  ;;  %v1596_v37 = vmul.f32 %v3809_v32, %v3809_v32 }
 0x3d3   :  { %v3815_v57 = vsub.f32 %v3610_v53, %v1523_v20  ;;  %v1673_v59 = vsel %vm424_vm2, %v1596_v37, 0.0 }
 0x3d4   :  { %v1459_v30 = vpop.xlane.xlu0 %1458  ;;  %1674 = vadd.xlane.f32.xlu1 %v1673_v59 }
 0x3d5   :  { %v1524_v1 = vmul.f32 0.03125, %v1459_v30  ;;  %v1597_v61 = vmul.f32 %v3815_v57, %v3815_v57 }
 0x3d7   :  { %v3821_v11 = vsub.f32 %v3615_v35, %v1524_v1  ;;  %v1676_v47 = vsel %vm424_vm2, %v1597_v61, 0.0 }
 0x3d8   :  { %1677 = vadd.xlane.f32.xlu0 %v1676_v47  ;;  %v1462_v28 = vpop.xlane.xlu1 %1461 }
 0x3d9   :  { %v1525_v52 = vmul.f32 0.03125, %v1462_v28  ;;  %v1598_v53 = vmul.f32 %v3821_v11, %v3821_v11 }
 0x3db   :  { %v3827_v17 = vsub.f32 %v3620_v34, %v1525_v52  ;;  %v1679_v21 = vsel %vm424_vm2, %v1598_v53, 0.0 }
 0x3dc   :  { %v1465_v9 = vpop.xlane.xlu0 %1464  ;;  %1680 = vadd.xlane.f32.xlu1 %v1679_v21 }
 0x3dd   :  { %v1526_v22 = vmul.f32 0.03125, %v1465_v9  ;;  %v1599_v35 = vmul.f32 %v3827_v17, %v3827_v17 }
 0x3df   :  { %v3833_v46 = vsub.f32 %v3625_v5, %v1526_v22  ;;  %v1682_v19 = vsel %vm424_vm2, %v1599_v35, 0.0 }
 0x3e0   :  { %1683 = vadd.xlane.f32.xlu0 %v1682_v19  ;;  %v1468_v12 = vpop.xlane.xlu1 %1467 }
 0x3e1   :  { %v1527_v50 = vmul.f32 0.03125, %v1468_v12  ;;  %v1600_v34 = vmul.f32 %v3833_v46, %v3833_v46 }
 0x3e3   :  { %v3839_v51 = vsub.f32 %v3630_v48, %v1527_v50  ;;  %v1685_v41 = vsel %vm424_vm2, %v1600_v34, 0.0 }
 0x3e4   :  { %v1471_v58 = vpop.xlane.xlu0 %1470  ;;  %1686 = vadd.xlane.f32.xlu1 %v1685_v41 }
 0x3e5   :  { %v1528_v33 = vmul.f32 0.03125, %v1471_v58  ;;  %v1601_v5 = vmul.f32 %v3839_v51, %v3839_v51 }
 0x3e7   :  { %v3845_v8 = vsub.f32 %v3635_v63, %v1528_v33  ;;  %v1688_v44 = vsel %vm424_vm2, %v1601_v5, 0.0 }
 0x3e8   :  { %1689 = vadd.xlane.f32.xlu0 %v1688_v44  ;;  %v1474_v20 = vpop.xlane.xlu1 %1473 }
 0x3e9   :  { %v1529_v37 = vmul.f32 0.03125, %v1474_v20  ;;  %v1602_v48 = vmul.f32 %v3845_v8, %v3845_v8 }
 0x3eb   :  { %v3851_v59 = vsub.f32 %v3640_v49, %v1529_v37  ;;  %v1691_v30 = vsel %vm424_vm2, %v1602_v48, 0.0 }
 0x3ec   :  { %v1477_v1 = vpop.xlane.xlu0 %1476  ;;  %1692 = vadd.xlane.f32.xlu1 %v1691_v30 }
 0x3ed   :  { %v1530_v61 = vmul.f32 0.03125, %v1477_v1  ;;  %v1603_v63 = vmul.f32 %v3851_v59, %v3851_v59 }
 0x3ef   :  { %v3857_v47 = vsub.f32 %v3645_v27, %v1530_v61  ;;  %v1694_v28 = vsel %vm424_vm2, %v1603_v63, 0.0 }
 0x3f0   :  { %1695 = vadd.xlane.f32.xlu0 %v1694_v28  ;;  %v1480_v52 = vpop.xlane.xlu1 %1479 }
 0x3f1   :  { %v1531_v53 = vmul.f32 0.03125, %v1480_v52  ;;  %v1604_v49 = vmul.f32 %v3857_v47, %v3857_v47 }
 0x3f3   :  { %v3863_v21 = vsub.f32 %v3650_v55, %v1531_v53  ;;  %v1697_v9 = vsel %vm424_vm2, %v1604_v49, 0.0 }
 0x3f4   :  { %v1483_v22 = vpop.xlane.xlu0 %1482  ;;  %1698 = vadd.xlane.f32.xlu1 %v1697_v9 }
 0x3f5   :  { %v1532_v35 = vmul.f32 0.03125, %v1483_v22  ;;  %v1605_v27 = vmul.f32 %v3863_v21, %v3863_v21 }
 0x3f7   :  { %v3869_v19 = vsub.f32 %v3655_v45, %v1532_v35  ;;  %v1700_v12 = vsel %vm424_vm2, %v1605_v27, 0.0 }
 0x3f8   :  { %1701 = vadd.xlane.f32.xlu0 %v1700_v12  ;;  %v1486_v50 = vpop.xlane.xlu1 %1485 }
 0x3f9   :  { %v1533_v34 = vmul.f32 0.03125, %v1486_v50  ;;  %v1606_v55 = vmul.f32 %v3869_v19, %v3869_v19 }
 0x3fb   :  { %v3875_v41 = vsub.f32 %v3660_v24, %v1533_v34  ;;  %v1703_v58 = vsel %vm424_vm2, %v1606_v55, 0.0 }
 0x3fc   :  { %v1489_v33 = vpop.xlane.xlu0 %1488  ;;  %1704 = vadd.xlane.f32.xlu1 %v1703_v58 }
 0x3fd   :  { %v1534_v5 = vmul.f32 0.03125, %v1489_v33  ;;  %v1607_v45 = vmul.f32 %v3875_v41, %v3875_v41 }
 0x3ff   :  { %v3881_v44 = vsub.f32 %v3665_v40, %v1534_v5  ;;  %v1706_v20 = vsel %vm424_vm2, %v1607_v45, 0.0 }
 0x400   :  { %1707 = vadd.xlane.f32.xlu0 %v1706_v20  ;;  %v1492_v37 = vpop.xlane.xlu1 %1491 }
 0x401   :  { %v1535_v48 = vmul.f32 0.03125, %v1492_v37  ;;  %v1608_v24 = vmul.f32 %v3881_v44, %v3881_v44 }
 0x403   :  { %v3887_v30 = vsub.f32 %v3670_v15, %v1535_v48  ;;  %v1709_v1 = vsel %vm424_vm2, %v1608_v24, 0.0  ;;  %v1874_v48 = vsub.s32 4, %v2836_v43 }
 0x404   :  { %v1495_v61 = vpop.xlane.xlu0 %1494  ;;  %1710 = vadd.xlane.f32.xlu1 %v1709_v1  ;;  %v1915_v1 = vsub.s32 5, %v2836_v43 }
 0x405   :  { %v1536_v63 = vmul.f32 0.03125, %v1495_v61  ;;  %v1609_v40 = vmul.f32 %v3887_v30, %v3887_v30 }
 0x407   :  { %v3893_v28 = vsub.f32 %v3675_v60, %v1536_v63  ;;  %v1712_v52 = vsel %vm424_vm2, %v1609_v40, 0.0  ;;  %v3914_v40 = vrot.slane %v3499_v31, %v1874_v48 }
 0x408   :  { %1713 = vadd.xlane.f32.xlu0 %v1712_v52  ;;  %v1498_v53 = vpop.xlane.xlu1 %1497 }
 0x409   :  { %v1537_v49 = vmul.f32 0.03125, %v1498_v53  ;;  %v1610_v15 = vmul.f32 %v3893_v28, %v3893_v28 }
 0x40b   :  { %v3899_v9 = vsub.f32 %v3680_v2, %v1537_v49  ;;  %v1715_v22 = vsel %vm424_vm2, %v1610_v15, 0.0  ;;  %v3917_v49 = vrot.slane %v3499_v31, %v1915_v1 }
 0x40c   :  { %1716 = vadd.xlane.f32.xlu1 %v1715_v22  ;;  %v1501_v35 = vpop.xlane.xlu0 %1500 }
 0x40d   :  { %v1538_v27 = vmul.f32 0.03125, %v1501_v35  ;;  %v1611_v60 = vmul.f32 %v3899_v9, %v3899_v9 }
 0x40f   :  { %v3905_v12 = vsub.f32 %v3685_v6, %v1538_v27  ;;  %v1718_v50 = vsel %vm424_vm2, %v1611_v60, 0.0 }
 0x410   :  { %1719 = vadd.xlane.f32.xlu0 %v1718_v50 }
 0x411   :  { %v1615_v34 = vpop.xlane.xlu1 %1614  ;;  %v1612_v55 = vmul.f32 %v3905_v12, %v3905_v12 }
 0x412   :  { %v1724_v2 = vmul.f32 0.03125, %v1615_v34 }
 0x413   :  { %v1721_v58 = vsel %vm424_vm2, %v1612_v55, 0.0 }
 0x414   :  { %v1761_v33 = vadd.f32 1e-05, %v1724_v2  ;;  %1722 = vadd.xlane.f32.xlu1 %v1721_v58 }
 0x415   :  { %v1618_v5 = vpop.xlane.xlu0 %1617 }
 0x416   :  { %2506 = vrsqrt.f32 %v1761_v33  ;;  %v1725_v45 = vmul.f32 0.03125, %v1618_v5 }
 0x418   :  { %v1762_v20 = vadd.f32 1e-05, %v1725_v45 }
 0x419   :  { %v1621_v37 = vpop.xlane.xlu1 %1620 }
 0x41a   :  { %2508 = vrsqrt.f32 %v1762_v20  ;;  %v1726_v6 = vmul.f32 0.03125, %v1621_v37 }
 0x41c   :  { %v1763_v24 = vadd.f32 1e-05, %v1726_v6 }
 0x41d   :  { %v1624_v61 = vpop.xlane.xlu0 %1623 }
 0x41e   :  { %2510 = vrsqrt.f32 %v1763_v24  ;;  %v1727_v63 = vmul.f32 0.03125, %v1624_v61 }
 0x420   :  { %v2507_v52 = vpop.eup %2506  ;;  %v1764_v53 = vadd.f32 1e-05, %v1727_v63 }
 0x421   :  { %v1835_v15 = vmul.f32 %v2507_v52, %v3690_v10  ;;  %v1627_v22 = vpop.xlane.xlu1 %1626 }
 0x422   :  { %2512 = vrsqrt.f32 %v1764_v53  ;;  %v1728_v35 = vmul.f32 0.03125, %v1627_v22 }
 0x423   :  { %v1876_v27 = vmul.f32 %v3914_v40, %v1835_v15 }
 0x424   :  { %v2509_v60 = vpop.eup %2508  ;;  %v1765_v43 = vadd.f32 1e-05, %v1728_v35 }
 0x425   :  { %v1917_v50 = vadd.f32 %v3917_v49, %v1876_v27  ;;  %v1836_v34 = vmul.f32 %v2509_v60, %v3695_v7  ;;  %v1630_v55 = vpop.xlane.xlu0 %1629 }
 0x426   :  { %2514 = vrsqrt.f32 %v1765_v43  ;;  %v1729_v2 = vmul.f32 0.03125, %v1630_v55 }
 0x427   :  { %v1954_v58 = vmax.f32 %v1917_v50, 0.0  ;;  %v1877_v31 = vmul.f32 %v3914_v40, %v1836_v34 }
 0x428   :  { %v2511_v33 = vpop.eup %2510  ;;  %v1766_v5 = vadd.f32 1e-05, %v1729_v2 }
 0x429   :  { %1991 = vst.msk [vmem:[%s4181_s3] sm:$0xff] %vm424_vm2, %v1954_v58  ;;  %v1918_v10 = vadd.f32 %v3917_v49, %v1877_v31  ;;  %v1837_v45 = vmul.f32 %v2511_v33, %v3701_v42  ;;  %v1633_v20 = vpop.xlane.xlu1 %1632 }
 0x42a   :  { %2516 = vrsqrt.f32 %v1766_v5  ;;  %v1730_v7 = vmul.f32 0.03125, %v1633_v20 }
 0x42b   :  { %v1955_v37 = vmax.f32 %v1918_v10, 0.0  ;;  %v1878_v6 = vmul.f32 %v3914_v40, %v1837_v45 }
 0x42c   :  { %v2513_v48 = vpop.eup %2512  ;;  %v1767_v24 = vadd.f32 1e-05, %v1730_v7 }
 0x42d   :  { %1992 = vst.msk [vmem:[%s4181_s3 + $0x8] sm:$0xff] %vm424_vm2, %v1955_v37  ;;  %v1919_v1 = vadd.f32 %v3917_v49, %v1878_v6  ;;  %v1838_v61 = vmul.f32 %v2513_v48, %v3707_v14  ;;  %v1636_v63 = vpop.xlane.xlu0 %1635 }
 0x42e   :  { %2518 = vrsqrt.f32 %v1767_v24  ;;  %v1731_v42 = vmul.f32 0.03125, %v1636_v63 }
 0x42f   :  { %v1956_v52 = vmax.f32 %v1919_v1, 0.0  ;;  %v1879_v53 = vmul.f32 %v3914_v40, %v1838_v61 }
 0x430   :  { %v2515_v15 = vpop.eup %2514  ;;  %v1768_v22 = vadd.f32 1e-05, %v1731_v42 }
 0x431   :  { %1993 = vst.msk [vmem:[%s4181_s3 + $0x10] sm:$0xff] %vm424_vm2, %v1956_v52  ;;  %v1920_v35 = vadd.f32 %v3917_v49, %v1879_v53  ;;  %v1839_v27 = vmul.f32 %v2515_v15, %v3713_v25  ;;  %v1639_v60 = vpop.xlane.xlu1 %1638 }
 0x432   :  { %2520 = vrsqrt.f32 %v1768_v22  ;;  %v1732_v14 = vmul.f32 0.03125, %v1639_v60 }
 0x433   :  { %v1957_v43 = vmax.f32 %v1920_v35, 0.0  ;;  %v1880_v50 = vmul.f32 %v3914_v40, %v1839_v27 }
 0x434   :  { %v2517_v34 = vpop.eup %2516  ;;  %v1769_v55 = vadd.f32 1e-05, %v1732_v14 }
 0x435   :  { %1994 = vst.msk [vmem:[%s4181_s3 + $0x18] sm:$0xff] %vm424_vm2, %v1957_v43  ;;  %v1921_v2 = vadd.f32 %v3917_v49, %v1880_v50  ;;  %v1840_v58 = vmul.f32 %v2517_v34, %v3719_v13  ;;  %v1642_v31 = vpop.xlane.xlu0 %1641 }
 0x436   :  { %2522 = vrsqrt.f32 %v1769_v55  ;;  %v1733_v25 = vmul.f32 0.03125, %v1642_v31 }
 0x437   :  { %v1958_v33 = vmax.f32 %v1921_v2, 0.0  ;;  %v1881_v5 = vmul.f32 %v3914_v40, %v1840_v58 }
 0x438   :  { %v2519_v10 = vpop.eup %2518  ;;  %v1770_v45 = vadd.f32 1e-05, %v1733_v25 }
 0x439   :  { %1995 = vst.msk [vmem:[%s4181_s3 + $0x20] sm:$0xff] %vm424_vm2, %v1958_v33  ;;  %v1922_v20 = vadd.f32 %v3917_v49, %v1881_v5  ;;  %v1841_v7 = vmul.f32 %v2519_v10, %v3725_v0  ;;  %v1645_v37 = vpop.xlane.xlu1 %1644 }
 0x43a   :  { %2524 = vrsqrt.f32 %v1770_v45  ;;  %v1734_v13 = vmul.f32 0.03125, %v1645_v37 }
 0x43b   :  { %v1959_v6 = vmax.f32 %v1922_v20, 0.0  ;;  %v1882_v48 = vmul.f32 %v3914_v40, %v1841_v7 }
 0x43c   :  { %v2521_v24 = vpop.eup %2520  ;;  %v1771_v1 = vadd.f32 1e-05, %v1734_v13 }
 0x43d   :  { %1996 = vst.msk [vmem:[%s4181_s3 + $0x28] sm:$0xff] %vm424_vm2, %v1959_v6  ;;  %v1923_v61 = vadd.f32 %v3917_v49, %v1882_v48  ;;  %v1842_v63 = vmul.f32 %v2521_v24, %v3731_v23  ;;  %v1648_v42 = vpop.xlane.xlu0 %1647 }
 0x43e   :  { %2526 = vrsqrt.f32 %v1771_v1  ;;  %v1735_v0 = vmul.f32 0.03125, %v1648_v42 }
 0x43f   :  { %v1960_v52 = vmax.f32 %v1923_v61, 0.0  ;;  %v1883_v53 = vmul.f32 %v3914_v40, %v1842_v63 }
 0x440   :  { %v2523_v15 = vpop.eup %2522  ;;  %v1772_v22 = vadd.f32 1e-05, %v1735_v0 }
 0x441   :  { %1997 = vst.msk [vmem:[%s4181_s3 + $0x30] sm:$0xff] %vm424_vm2, %v1960_v52  ;;  %v1924_v35 = vadd.f32 %v3917_v49, %v1883_v53  ;;  %v1843_v27 = vmul.f32 %v2523_v15, %v3737_v18  ;;  %v1651_v60 = vpop.xlane.xlu1 %1650 }
 0x442   :  { %2528 = vrsqrt.f32 %v1772_v22  ;;  %v1736_v23 = vmul.f32 0.03125, %v1651_v60 }
 0x443   :  { %v1961_v14 = vmax.f32 %v1924_v35, 0.0  ;;  %v1884_v43 = vmul.f32 %v3914_v40, %v1843_v27 }
 0x444   :  { %v2525_v50 = vpop.eup %2524  ;;  %v1773_v34 = vadd.f32 1e-05, %v1736_v23 }
 0x445   :  { %1998 = vst.msk [vmem:[%s4181_s3 + $0x38] sm:$0xff] %vm424_vm2, %v1961_v14  ;;  %v1925_v55 = vadd.f32 %v3917_v49, %v1884_v43  ;;  %v1844_v2 = vmul.f32 %v2525_v50, %v3743_v39  ;;  %v1654_v58 = vpop.xlane.xlu0 %1653 }
 0x446   :  { %2530 = vrsqrt.f32 %v1773_v34  ;;  %v1737_v18 = vmul.f32 0.03125, %v1654_v58 }
 0x447   :  { %v1962_v31 = vmax.f32 %v1925_v55, 0.0  ;;  %v1885_v25 = vmul.f32 %v3914_v40, %v1844_v2 }
 0x448   :  { %v2527_v33 = vpop.eup %2526  ;;  %v1774_v5 = vadd.f32 1e-05, %v1737_v18 }
 0x449   :  { %1999 = vst.msk [vmem:[%s4181_s3 + $0x40] sm:$0xff] %vm424_vm2, %v1962_v31  ;;  %v1926_v10 = vadd.f32 %v3917_v49, %v1885_v25  ;;  %v1845_v45 = vmul.f32 %v2527_v33, %v3749_v16  ;;  %v1657_v20 = vpop.xlane.xlu1 %1656 }
 0x44a   :  { %2532 = vrsqrt.f32 %v1774_v5  ;;  %v1738_v39 = vmul.f32 0.03125, %v1657_v20 }
 0x44b   :  { %v1963_v7 = vmax.f32 %v1926_v10, 0.0  ;;  %v1886_v37 = vmul.f32 %v3914_v40, %v1845_v45 }
 0x44c   :  { %v2529_v13 = vpop.eup %2528  ;;  %v1775_v6 = vadd.f32 1e-05, %v1738_v39 }
 0x44d   :  { %2000 = vst.msk [vmem:[%s4181_s3 + $0x48] sm:$0xff] %vm424_vm2, %v1963_v7  ;;  %v1927_v48 = vadd.f32 %v3917_v49, %v1886_v37  ;;  %v1846_v24 = vmul.f32 %v2529_v13, %v3755_v36  ;;  %v1660_v1 = vpop.xlane.xlu0 %1659 }
 0x44e   :  { %2534 = vrsqrt.f32 %v1775_v6  ;;  %v1739_v16 = vmul.f32 0.03125, %v1660_v1 }
 0x44f   :  { %v1964_v61 = vmax.f32 %v1927_v48, 0.0  ;;  %v1887_v63 = vmul.f32 %v3914_v40, %v1846_v24 }
 0x450   :  { %v2531_v42 = vpop.eup %2530  ;;  %v1776_v0 = vadd.f32 1e-05, %v1739_v16 }
 0x451   :  { %2001 = vst.msk [vmem:[%s4181_s3 + $0x50] sm:$0xff] %vm424_vm2, %v1964_v61  ;;  %v1928_v52 = vadd.f32 %v3917_v49, %v1887_v63  ;;  %v1847_v53 = vmul.f32 %v2531_v42, %v3761_v26  ;;  %v1663_v15 = vpop.xlane.xlu1 %1662 }
 0x452   :  { %2536 = vrsqrt.f32 %v1776_v0  ;;  %v1740_v36 = vmul.f32 0.03125, %v1663_v15 }
 0x453   :  { %v1965_v22 = vmax.f32 %v1928_v52, 0.0  ;;  %v1888_v35 = vmul.f32 %v3914_v40, %v1847_v53 }
 0x454   :  { %v2533_v27 = vpop.eup %2532  ;;  %v1777_v60 = vadd.f32 1e-05, %v1740_v36 }
 0x455   :  { %2002 = vst.msk [vmem:[%s4181_s3 + $0x58] sm:$0xff] %vm424_vm2, %v1965_v22  ;;  %v1929_v23 = vadd.f32 %v3917_v49, %v1888_v35  ;;  %v1848_v14 = vmul.f32 %v2533_v27, %v3767_v4  ;;  %v1666_v43 = vpop.xlane.xlu0 %1665 }
 0x456   :  { %2538 = vrsqrt.f32 %v1777_v60  ;;  %v1741_v26 = vmul.f32 0.03125, %v1666_v43 }
 0x457   :  { %v1966_v50 = vmax.f32 %v1929_v23, 0.0  ;;  %v1889_v34 = vmul.f32 %v3914_v40, %v1848_v14 }
 0x458   :  { %v2535_v55 = vpop.eup %2534  ;;  %v1778_v2 = vadd.f32 1e-05, %v1741_v26 }
 0x459   :  { %2003 = vst.msk [vmem:[%s4181_s3 + $0x60] sm:$0xff] %vm424_vm2, %v1966_v50  ;;  %v1930_v58 = vadd.f32 %v3917_v49, %v1889_v34  ;;  %v1849_v18 = vmul.f32 %v2535_v55, %v3773_v56  ;;  %v1669_v31 = vpop.xlane.xlu1 %1668 }
 0x45a   :  { %2540 = vrsqrt.f32 %v1778_v2  ;;  %v1742_v4 = vmul.f32 0.03125, %v1669_v31 }
 0x45b   :  { %v1967_v25 = vmax.f32 %v1930_v58, 0.0  ;;  %v1890_v33 = vmul.f32 %v3914_v40, %v1849_v18 }
 0x45c   :  { %v2537_v5 = vpop.eup %2536  ;;  %v1779_v10 = vadd.f32 1e-05, %v1742_v4 }
 0x45d   :  { %2004 = vst.msk [vmem:[%s4181_s3 + $0x68] sm:$0xff] %vm424_vm2, %v1967_v25  ;;  %v1931_v45 = vadd.f32 %v3917_v49, %v1890_v33  ;;  %v1850_v20 = vmul.f32 %v2537_v5, %v3779_v38  ;;  %v1672_v39 = vpop.xlane.xlu0 %1671 }
 0x45e   :  { %2542 = vrsqrt.f32 %v1779_v10  ;;  %v1743_v56 = vmul.f32 0.03125, %v1672_v39 }
 0x45f   :  { %v1968_v7 = vmax.f32 %v1931_v45, 0.0  ;;  %v1891_v37 = vmul.f32 %v3914_v40, %v1850_v20 }
 0x460   :  { %v2539_v13 = vpop.eup %2538  ;;  %v1780_v6 = vadd.f32 1e-05, %v1743_v56 }
 0x461   :  { %2005 = vst.msk [vmem:[%s4181_s3 + $0x70] sm:$0xff] %vm424_vm2, %v1968_v7  ;;  %v1932_v48 = vadd.f32 %v3917_v49, %v1891_v37  ;;  %v1851_v24 = vmul.f32 %v2539_v13, %v3785_v3  ;;  %v1675_v1 = vpop.xlane.xlu1 %1674 }
 0x462   :  { %2544 = vrsqrt.f32 %v1780_v6  ;;  %v1744_v38 = vmul.f32 0.03125, %v1675_v1 }
 0x463   :  { %v1969_v16 = vmax.f32 %v1932_v48, 0.0  ;;  %v1892_v61 = vmul.f32 %v3914_v40, %v1851_v24 }
 0x464   :  { %v2541_v63 = vpop.eup %2540  ;;  %v1781_v42 = vadd.f32 1e-05, %v1744_v38 }
 0x465   :  { %2006 = vst.msk [vmem:[%s4181_s3 + $0x78] sm:$0xff] %vm424_vm2, %v1969_v16  ;;  %v1933_v0 = vadd.f32 %v3917_v49, %v1892_v61  ;;  %v1852_v52 = vmul.f32 %v2541_v63, %v3791_v29  ;;  %v1678_v53 = vpop.xlane.xlu0 %1677 }
 0x466   :  { %2546 = vrsqrt.f32 %v1781_v42  ;;  %v1745_v3 = vmul.f32 0.03125, %v1678_v53 }
 0x467   :  { %v1970_v15 = vmax.f32 %v1933_v0, 0.0  ;;  %v1893_v36 = vmul.f32 %v3914_v40, %v1852_v52 }
 0x468   :  { %v2543_v22 = vpop.eup %2542  ;;  %v1782_v35 = vadd.f32 1e-05, %v1745_v3 }
 0x469   :  { %2007 = vst.msk [vmem:[%s4181_s3 + $0x80] sm:$0xff] %vm424_vm2, %v1970_v15  ;;  %v1934_v27 = vadd.f32 %v3917_v49, %v1893_v36  ;;  %v1853_v60 = vmul.f32 %v2543_v22, %v3797_v62  ;;  %v1681_v23 = vpop.xlane.xlu1 %1680 }
 0x46a   :  { %2548 = vrsqrt.f32 %v1782_v35  ;;  %v1746_v29 = vmul.f32 0.03125, %v1681_v23 }
 0x46b   :  { %v1971_v14 = vmax.f32 %v1934_v27, 0.0  ;;  %v1894_v43 = vmul.f32 %v3914_v40, %v1853_v60 }
 0x46c   :  { %v2545_v26 = vpop.eup %2544  ;;  %v1783_v50 = vadd.f32 1e-05, %v1746_v29 }
 0x46d   :  { %2008 = vst.msk [vmem:[%s4181_s3 + $0x88] sm:$0xff] %vm424_vm2, %v1971_v14  ;;  %v1935_v34 = vadd.f32 %v3917_v49, %v1894_v43  ;;  %v1854_v55 = vmul.f32 %v2545_v26, %v3803_v54  ;;  %v1684_v2 = vpop.xlane.xlu0 %1683 }
 0x46e   :  { %2550 = vrsqrt.f32 %v1783_v50  ;;  %v1747_v62 = vmul.f32 0.03125, %v1684_v2 }
 0x46f   :  { %v1972_v58 = vmax.f32 %v1935_v34, 0.0  ;;  %v1895_v18 = vmul.f32 %v3914_v40, %v1854_v55 }
 0x470   :  { %v2547_v31 = vpop.eup %2546  ;;  %v1784_v4 = vadd.f32 1e-05, %v1747_v62 }
 0x471   :  { %2009 = vst.msk [vmem:[%s4181_s3 + $0x90] sm:$0xff] %vm424_vm2, %v1972_v58  ;;  %v1936_v25 = vadd.f32 %v3917_v49, %v1895_v18  ;;  %v1855_v33 = vmul.f32 %v2547_v31, %v3809_v32  ;;  %v1687_v5 = vpop.xlane.xlu1 %1686 }
 0x472   :  { %2552 = vrsqrt.f32 %v1784_v4  ;;  %v1748_v54 = vmul.f32 0.03125, %v1687_v5 }
 0x473   :  { %v1973_v10 = vmax.f32 %v1936_v25, 0.0  ;;  %v1896_v45 = vmul.f32 %v3914_v40, %v1855_v33 }
 0x474   :  { %v2549_v20 = vpop.eup %2548  ;;  %v1785_v39 = vadd.f32 1e-05, %v1748_v54 }
 0x475   :  { %2010 = vst.msk [vmem:[%s4181_s3 + $0x98] sm:$0xff] %vm424_vm2, %v1973_v10  ;;  %v1937_v56 = vadd.f32 %v3917_v49, %v1896_v45  ;;  %v1856_v7 = vmul.f32 %v2549_v20, %v3815_v57  ;;  %v1690_v37 = vpop.xlane.xlu0 %1689 }
 0x476   :  { %2554 = vrsqrt.f32 %v1785_v39  ;;  %v1749_v32 = vmul.f32 0.03125, %v1690_v37 }
 0x477   :  { %v1974_v13 = vmax.f32 %v1937_v56, 0.0  ;;  %v1897_v6 = vmul.f32 %v3914_v40, %v1856_v7 }
 0x478   :  { %v2551_v48 = vpop.eup %2550  ;;  %v1786_v24 = vadd.f32 1e-05, %v1749_v32 }
 0x479   :  { %2011 = vst.msk [vmem:[%s4181_s3 + $0xa0] sm:$0xff] %vm424_vm2, %v1974_v13  ;;  %v1938_v1 = vadd.f32 %v3917_v49, %v1897_v6  ;;  %v1857_v38 = vmul.f32 %v2551_v48, %v3821_v11  ;;  %v1693_v16 = vpop.xlane.xlu1 %1692 }
 0x47a   :  { %2556 = vrsqrt.f32 %v1786_v24  ;;  %v1750_v57 = vmul.f32 0.03125, %v1693_v16 }
 0x47b   :  { %v1975_v61 = vmax.f32 %v1938_v1, 0.0  ;;  %v1898_v63 = vmul.f32 %v3914_v40, %v1857_v38 }
 0x47c   :  { %v2553_v42 = vpop.eup %2552  ;;  %v1787_v0 = vadd.f32 1e-05, %v1750_v57 }
 0x47d   :  { %2012 = vst.msk [vmem:[%s4181_s3 + $0xa8] sm:$0xff] %vm424_vm2, %v1975_v61  ;;  %v1939_v52 = vadd.f32 %v3917_v49, %v1898_v63  ;;  %v1858_v53 = vmul.f32 %v2553_v42, %v3827_v17  ;;  %v1696_v3 = vpop.xlane.xlu0 %1695 }
 0x47e   :  { %2558 = vrsqrt.f32 %v1787_v0  ;;  %v1751_v11 = vmul.f32 0.03125, %v1696_v3 }
 0x47f   :  { %v1976_v15 = vmax.f32 %v1939_v52, 0.0  ;;  %v1899_v36 = vmul.f32 %v3914_v40, %v1858_v53 }
 0x480   :  { %v2555_v22 = vpop.eup %2554  ;;  %v1788_v35 = vadd.f32 1e-05, %v1751_v11 }
 0x481   :  { %2013 = vst.msk [vmem:[%s4181_s3 + $0xb0] sm:$0xff] %vm424_vm2, %v1976_v15  ;;  %v1940_v27 = vadd.f32 %v3917_v49, %v1899_v36  ;;  %v1859_v60 = vmul.f32 %v2555_v22, %v3833_v46  ;;  %v1699_v23 = vpop.xlane.xlu1 %1698 }
 0x482   :  { %2560 = vrsqrt.f32 %v1788_v35  ;;  %v1752_v17 = vmul.f32 0.03125, %v1699_v23 }
 0x483   :  { %v1977_v29 = vmax.f32 %v1940_v27, 0.0  ;;  %v1900_v14 = vmul.f32 %v3914_v40, %v1859_v60 }
 0x484   :  { %v2557_v43 = vpop.eup %2556  ;;  %v1789_v26 = vadd.f32 1e-05, %v1752_v17 }
 0x485   :  { %2014 = vst.msk [vmem:[%s4181_s3 + $0xb8] sm:$0xff] %vm424_vm2, %v1977_v29  ;;  %v1941_v50 = vadd.f32 %v3917_v49, %v1900_v14  ;;  %v1860_v34 = vmul.f32 %v2557_v43, %v3839_v51  ;;  %v1702_v55 = vpop.xlane.xlu0 %1701 }
 0x486   :  { %2562 = vrsqrt.f32 %v1789_v26  ;;  %v1753_v46 = vmul.f32 0.03125, %v1702_v55 }
 0x487   :  { %v1978_v2 = vmax.f32 %v1941_v50, 0.0  ;;  %v1901_v62 = vmul.f32 %v3914_v40, %v1860_v34 }
 0x488   :  { %v2559_v58 = vpop.eup %2558  ;;  %v1790_v18 = vadd.f32 1e-05, %v1753_v46 }
 0x489   :  { %2015 = vst.msk [vmem:[%s4181_s3 + $0xc0] sm:$0xff] %vm424_vm2, %v1978_v2  ;;  %v1942_v31 = vadd.f32 %v3917_v49, %v1901_v62  ;;  %v1861_v4 = vmul.f32 %v2559_v58, %v3845_v8  ;;  %v1705_v25 = vpop.xlane.xlu1 %1704 }
 0x48a   :  { %2564 = vrsqrt.f32 %v1790_v18  ;;  %v1754_v51 = vmul.f32 0.03125, %v1705_v25 }
 0x48b   :  { %v1979_v33 = vmax.f32 %v1942_v31, 0.0  ;;  %v1902_v5 = vmul.f32 %v3914_v40, %v1861_v4 }
 0x48c   :  { %v2561_v54 = vpop.eup %2560  ;;  %v1791_v10 = vadd.f32 1e-05, %v1754_v51 }
 0x48d   :  { %2016 = vst.msk [vmem:[%s4181_s3 + $0xc8] sm:$0xff] %vm424_vm2, %v1979_v33  ;;  %v1943_v45 = vadd.f32 %v3917_v49, %v1902_v5  ;;  %v1862_v20 = vmul.f32 %v2561_v54, %v3851_v59  ;;  %v1708_v39 = vpop.xlane.xlu0 %1707 }
 0x48e   :  { %2566 = vrsqrt.f32 %v1791_v10  ;;  %v1755_v8 = vmul.f32 0.03125, %v1708_v39 }
 0x48f   :  { %v1980_v56 = vmax.f32 %v1943_v45, 0.0  ;;  %v1903_v7 = vmul.f32 %v3914_v40, %v1862_v20 }
 0x490   :  { %v2563_v37 = vpop.eup %2562  ;;  %v1792_v32 = vadd.f32 1e-05, %v1755_v8 }
 0x491   :  { %2017 = vst.msk [vmem:[%s4181_s3 + $0xd0] sm:$0xff] %vm424_vm2, %v1980_v56  ;;  %v1944_v13 = vadd.f32 %v3917_v49, %v1903_v7  ;;  %v1863_v6 = vmul.f32 %v2563_v37, %v3857_v47  ;;  %v1711_v48 = vpop.xlane.xlu1 %1710 }
 0x492   :  { %2568 = vrsqrt.f32 %v1792_v32  ;;  %v1756_v59 = vmul.f32 0.03125, %v1711_v48 }
 0x493   :  { %v1981_v24 = vmax.f32 %v1944_v13, 0.0  ;;  %v1904_v1 = vmul.f32 %v3914_v40, %v1863_v6 }
 0x494   :  { %v2565_v38 = vpop.eup %2564  ;;  %v1793_v16 = vadd.f32 1e-05, %v1756_v59 }
 0x495   :  { %2018 = vst.msk [vmem:[%s4181_s3 + $0xd8] sm:$0xff] %vm424_vm2, %v1981_v24  ;;  %v1945_v57 = vadd.f32 %v3917_v49, %v1904_v1  ;;  %v1864_v61 = vmul.f32 %v2565_v38, %v3863_v21  ;;  %v1714_v63 = vpop.xlane.xlu0 %1713 }
 0x496   :  { %2570 = vrsqrt.f32 %v1793_v16  ;;  %v1757_v47 = vmul.f32 0.03125, %v1714_v63 }
 0x497   :  { %v1982_v42 = vmax.f32 %v1945_v57, 0.0  ;;  %v1905_v0 = vmul.f32 %v3914_v40, %v1864_v61 }
 0x498   :  { %v2567_v52 = vpop.eup %2566  ;;  %v1794_v53 = vadd.f32 1e-05, %v1757_v47 }
 0x499   :  { %2019 = vst.msk [vmem:[%s4181_s3 + $0xe0] sm:$0xff] %vm424_vm2, %v1982_v42  ;;  %v1946_v3 = vadd.f32 %v3917_v49, %v1905_v0  ;;  %v1865_v11 = vmul.f32 %v2567_v52, %v3869_v19  ;;  %v1717_v15 = vpop.xlane.xlu1 %1716 }
 0x49a   :  { %2572 = vrsqrt.f32 %v1794_v53  ;;  %v1758_v21 = vmul.f32 0.03125, %v1717_v15 }
 0x49b   :  { %v1983_v36 = vmax.f32 %v1946_v3, 0.0  ;;  %v1906_v22 = vmul.f32 %v3914_v40, %v1865_v11 }
 0x49c   :  { %v2569_v35 = vpop.eup %2568  ;;  %v1795_v27 = vadd.f32 1e-05, %v1758_v21 }
 0x49d   :  { %2020 = vst.msk [vmem:[%s4181_s3 + $0xe8] sm:$0xff] %vm424_vm2, %v1983_v36  ;;  %v1947_v60 = vadd.f32 %v3917_v49, %v1906_v22  ;;  %v1866_v23 = vmul.f32 %v2569_v35, %v3875_v41  ;;  %v1720_v17 = vpop.xlane.xlu0 %1719 }
 0x49e   :  { %2574 = vrsqrt.f32 %v1795_v27  ;;  %v1759_v19 = vmul.f32 0.03125, %v1720_v17 }
 0x49f   :  { %v1984_v29 = vmax.f32 %v1947_v60, 0.0  ;;  %v1907_v14 = vmul.f32 %v3914_v40, %v1866_v23 }
 0x4a0   :  { %v2571_v43 = vpop.eup %2570  ;;  %v1796_v26 = vadd.f32 1e-05, %v1759_v19 }
 0x4a1   :  { %2021 = vst.msk [vmem:[%s4181_s3 + $0xf0] sm:$0xff] %vm424_vm2, %v1984_v29  ;;  %v1948_v50 = vadd.f32 %v3917_v49, %v1907_v14  ;;  %v1867_v34 = vmul.f32 %v2571_v43, %v3881_v44  ;;  %v1723_v55 = vpop.xlane.xlu1 %1722 }
 0x4a2   :  { %2576 = vrsqrt.f32 %v1796_v26  ;;  %v1760_v41 = vmul.f32 0.03125, %v1723_v55 }
 0x4a3   :  { %v1985_v46 = vmax.f32 %v1948_v50, 0.0  ;;  %v1908_v2 = vmul.f32 %v3914_v40, %v1867_v34 }
 0x4a4   :  { %v2573_v62 = vpop.eup %2572  ;;  %v1797_v58 = vadd.f32 1e-05, %v1760_v41 }
 0x4a5   :  { %2022 = vst.msk [vmem:[%s4181_s3 + $0xf8] sm:$0xff] %vm424_vm2, %v1985_v46  ;;  %v1949_v18 = vadd.f32 %v3917_v49, %v1908_v2  ;;  %v1868_v31 = vmul.f32 %v2573_v62, %v3887_v30 }
 0x4a6   :  { %2578 = vrsqrt.f32 %v1797_v58 }
 0x4a7   :  { %v1986_v4 = vmax.f32 %v1949_v18, 0.0  ;;  %v1909_v44 = vmul.f32 %v3914_v40, %v1868_v31 }
 0x4a8   :  { %v2575_v25 = vpop.eup %2574 }
 0x4a9   :  { %2023 = vst.msk [vmem:[%s4181_s3 + $0x100] sm:$0xff] %vm424_vm2, %v1986_v4  ;;  %v1950_v51 = vadd.f32 %v3917_v49, %v1909_v44  ;;  %v1869_v33 = vmul.f32 %v2575_v25, %v3893_v28 }
 0x4ab   :  { %v1987_v5 = vmax.f32 %v1950_v51, 0.0  ;;  %v1910_v54 = vmul.f32 %v3914_v40, %v1869_v33 }
 0x4ac   :  { %v2577_v10 = vpop.eup %2576 }
 0x4ad   :  { %2024 = vst.msk [vmem:[%s4181_s3 + $0x108] sm:$0xff] %vm424_vm2, %v1987_v5  ;;  %v1951_v30 = vadd.f32 %v3917_v49, %v1910_v54  ;;  %v1870_v45 = vmul.f32 %v2577_v10, %v3899_v9 }
 0x4af   :  { %v1988_v20 = vmax.f32 %v1951_v30, 0.0  ;;  %v1911_v39 = vmul.f32 %v3914_v40, %v1870_v45 }
 0x4b0   :  { %v2579_v8 = vpop.eup %2578 }
 0x4b1   :  { %2025 = vst.msk [vmem:[%s4181_s3 + $0x110] sm:$0xff] %vm424_vm2, %v1988_v20  ;;  %v1952_v28 = vadd.f32 %v3917_v49, %v1911_v39  ;;  %v1871_v56 = vmul.f32 %v2579_v8, %v3905_v12 }
 0x4b3   :  { %v1989_v7 = vmax.f32 %v1952_v28, 0.0  ;;  %v1912_v37 = vmul.f32 %v3914_v40, %v1871_v56 }
 0x4b5   :  { %2026 = vst.msk [vmem:[%s4181_s3 + $0x118] sm:$0xff] %vm424_vm2, %v1989_v7  ;;  %v1953_v9 = vadd.f32 %v3917_v49, %v1912_v37 }
 0x4b7   :  { %v1990_v32 = vmax.f32 %v1953_v9, 0.0 }
 0x4b9   :  { %2027 = vst.msk [vmem:[%s4181_s3 + $0x120] sm:$0xff] %vm424_vm2, %v1990_v32 }

</bundles_post_ra>
